<compile_context>
chip_gen: v5e
topology: v5e:2x2
jax: 0.10.0
libtpu: 0.0.40
codegen_flags: <defaults>
</compile_context>

<pallas_src>
import jax
import jax.numpy as jnp
from jax.experimental import pallas as pl
from jax.experimental.pallas import tpu as pltpu

EPS_MSG = 1e-7       # GENConv message epsilon
BN_EPS = 1e-5        # BatchNorm epsilon
MXU_DTYPE = jnp.bfloat16   # MXU operand dtype (f32 accumulation everywhere)


# ----------------------------- Pallas kernels ------------------------------ #

def _dense_kernel(x_ref, w_ref, b_ref, o_ref):
    # x: [tm, K], w: [K, H], b: [1, H] -> o: [tm, H]  (bf16 MXU operands, f32 acc)
    o_ref[...] = (jnp.dot(x_ref[...].astype(MXU_DTYPE),
                          w_ref[...].astype(MXU_DTYPE),
                          preferred_element_type=jnp.float32) + b_ref[...])


def _fused_layers_pool_kernel(h0_ref, e_ref, adj_ref,
                              we_ref, be_ref, wm_ref, bm_ref,
                              bns_ref, bnb_ref, pooled_ref,
                              h_cur, h_new, psum):
    # grid = (B, L, DT): one graph (b), one GENConv layer (l), one dst-node tile (t).
    # h0 : [N, H]      pre-encoded node feats (DMA'd once per graph)
    # e  : [T*N, E]    flat edge feats for this dst tile (dst-major)
    # adj: [T, N]      adjacency rows for this dst tile
    # per-layer weights: we [E, H], be/bm/bns/bnb [1, H], wm [H, H]
    l = pl.program_id(1)
    t = pl.program_id(2)
    L = pl.num_programs(1)
    DT = pl.num_programs(2)
    N, H = h_cur.shape
    T = adj_ref.shape[0]

    # init persistent node-feature buffer at the start of each graph
    @pl.when(jnp.logical_and(l == 0, t == 0))
    def _():
        h_cur[...] = h0_ref[...]

    # init mean-pool accumulator at the start of the last layer
    @pl.when(jnp.logical_and(l == L - 1, t == 0))
    def _():
        psum[...] = jnp.zeros_like(psum)

    dst0 = pl.multiple_of(t * T, T)
    h_all = h_cur[...]                        # [N, H] previous-layer feats (all src nodes)
    h_dst = h_cur[pl.ds(dst0, T), :]          # [T, H] previous-layer feats (this dst tile)

    # --- edge encoder: one flat [T*N, E] @ [E, H] MXU matmul (bf16 operands) ---
    ee = (jnp.dot(e_ref[...].astype(MXU_DTYPE), we_ref[...].astype(MXU_DTYPE),
                  preferred_element_type=jnp.float32) + be_ref[...]).reshape(T, N, H)

    # --- message: relu(h_src + edge_emb) + eps  (strictly positive) ---
    msg = jnp.maximum(h_all[None, :, :] + ee, 0.0) + EPS_MSG          # [T, N, H]

    # --- masked per-feature softmax over incoming edges (src axis), no -1e30 pass ---
    # msg > 0, so max over edges == max(msg * adj); min(.,0) guards exp overflow on
    # non-edges (they are zeroed by * adjf anyway) and leaves edge values exact.
    adjf = adj_ref[...][:, :, None]                                   # [T, N, 1]
    mx = jnp.max(msg * adjf, axis=1, keepdims=True)                   # [T, 1, H]
    ex = jnp.exp(jnp.minimum(msg - mx, 0.0)) * adjf                   # [T, N, H]
    denom = jnp.sum(ex, axis=1)                                       # [T, H]
    num = jnp.sum(ex * msg, axis=1)                                   # [T, H]
    agg = num / (denom + 1e-16)                                       # exact division

    # --- node MLP on (h + agg), residual, folded BN, ReLU (dropout = no-op) ---
    out = jnp.dot((h_dst + agg).astype(MXU_DTYPE), wm_ref[...].astype(MXU_DTYPE),
                  preferred_element_type=jnp.float32) + bm_ref[...]
    out = out + h_dst
    out = jnp.maximum(out * bns_ref[...] + bnb_ref[...], 0.0)         # [T, H]

    h_new[pl.ds(dst0, T), :] = out

    # --- fused AvgPooling over nodes (accumulated on the last layer) ---
    @pl.when(l == L - 1)
    def _():
        psum[...] = psum[...] + jnp.sum(out, axis=0, keepdims=True)

    # publish this layer's features for the next layer once all dst tiles are done
    @pl.when(t == DT - 1)
    def _():
        h_cur[...] = h_new[...]

    @pl.when(jnp.logical_and(l == L - 1, t == DT - 1))
    def _():
        pooled_ref[...] = psum[...] * (1.0 / N)


# ------------------------------ host wrappers ------------------------------ #

def _vmem_limit_bytes():
    # TODO(synk): per-generation sweep (<=~48 MiB on v7x, up to 96 MiB on v5e/v6e).
    try:
        cap = pltpu.get_tpu_info().vmem_capacity_bytes
        return min((cap * 3) // 4, 96 * 1024 * 1024)
    except Exception:
        return 32 * 1024 * 1024


def _dense(x, w, b, *, tm=1024):
    M, K = x.shape
    H = w.shape[1]
    tm = min(tm, M)
    return pl.pallas_call(
        _dense_kernel,
        out_shape=jax.ShapeDtypeStruct((M, H), jnp.float32),
        grid_spec=pltpu.PrefetchScalarGridSpec(
            num_scalar_prefetch=0, grid=(pl.cdiv(M, tm),),
            in_specs=[pl.BlockSpec((tm, K), lambda i: (i, 0)),
                      pl.BlockSpec((K, H), lambda i: (0, 0)),
                      pl.BlockSpec((1, H), lambda i: (0, 0))],
            out_specs=pl.BlockSpec((tm, H), lambda i: (i, 0))),
        compiler_params=pltpu.CompilerParams(dimension_semantics=("parallel",)),
    )(x, w, b)


def fused_gcn_layers_pool(h, e_flat, adj, we_s, be_s, wm_s, bm_s, bns_s, bnb_s,
                          t_dst=None):
    B, N, H = h.shape
    E = e_flat.shape[-1]
    L = we_s.shape[0]
    if t_dst is None:
        t_dst = N if N <= 128 else 128   # TODO(synk): use 64 on v7x (64 MiB VMEM)
    assert N % t_dst == 0, "dst tile must divide N"
    DT = N // t_dst

    out = pl.pallas_call(
        _fused_layers_pool_kernel,
        out_shape=jax.ShapeDtypeStruct((B, 1, H), jnp.float32),
        grid_spec=pltpu.PrefetchScalarGridSpec(
            num_scalar_prefetch=0, grid=(B, L, DT),
            in_specs=[
                # pre-encoded node feats: DMA'd once per graph, constant over (l, t)
                pl.BlockSpec((None, N, H), lambda b, l, t: (b, 0, 0)),
                # flat edge feats, streamed per dst tile
                pl.BlockSpec((None, t_dst * N, E), lambda b, l, t: (b, t, 0)),
                # adjacency rows for this dst tile
                pl.BlockSpec((None, t_dst, N), lambda b, l, t: (b, t, 0)),
                # per-layer weights: indexed by l -> pipelined, ~2 layers resident
                pl.BlockSpec((None, E, H), lambda b, l, t: (l, 0, 0)),
                pl.BlockSpec((None, 1, H), lambda b, l, t: (l, 0, 0)),
                pl.BlockSpec((None, H, H), lambda b, l, t: (l, 0, 0)),
                pl.BlockSpec((None, 1, H), lambda b, l, t: (l, 0, 0)),
                pl.BlockSpec((None, 1, H), lambda b, l, t: (l, 0, 0)),
                pl.BlockSpec((None, 1, H), lambda b, l, t: (l, 0, 0)),
            ],
            out_specs=pl.BlockSpec((None, 1, H), lambda b, l, t: (b, 0, 0)),
            scratch_shapes=[
                pltpu.VMEM((N, H), jnp.float32),   # h_cur (previous-layer feats)
                pltpu.VMEM((N, H), jnp.float32),   # h_new (current-layer feats)
                pltpu.VMEM((1, H), jnp.float32),   # mean-pool accumulator
            ]),
        compiler_params=pltpu.CompilerParams(
            dimension_semantics=("parallel", "arbitrary", "arbitrary"),
            vmem_limit_bytes=_vmem_limit_bytes()),
    )(h, e_flat, adj, we_s, be_s, wm_s, bm_s, bns_s, bnb_s)
    return out.reshape(B, H)


def deeper_gcn_forward(node_feats, edge_feats, adj, w_pre, b_pre,
                       we_s, be_s, wm_s, bm_s, bns_s, bnb_s, w_out, b_out):
    B, N, Din = node_feats.shape
    H = w_pre.shape[1]
    E = edge_feats.shape[-1]
    # pre_encoder: one tiled [B*N, Din] @ [Din, H] matmul (B folded into M).
    # NOTE: pre_encoder_norm is constructed in __init__ but never applied in forward().
    h = _dense(node_feats.reshape(B * N, Din), w_pre, b_pre).reshape(B, N, H)
    # host-side flatten of edge feats (free; keeps the in-kernel MXU operand a view)
    e_flat = edge_feats.reshape(B, N * N, E)
    # fused GENConv stack (layer axis pipelined on the grid) + mean pooling
    pooled = fused_gcn_layers_pool(h, e_flat, adj,
                                   we_s, be_s, wm_s, bm_s, bns_s, bnb_s)
    # out_lay: one [B, H] @ [H, C] matmul.
    return _dense(pooled, w_out, b_out)


# --------------------------- pure-JAX reference ----------------------------- #
# Mirrors the kernel's numerics contract (bf16 MXU operands, f32 accumulation).

def _reference_forward(node_feats, edge_feats, adj, w_pre, b_pre,
                       we_s, be_s, wm_s, bm_s, bns_s, bnb_s, w_out, b_out):
    def mm(a, b):
        return jnp.dot(a.astype(MXU_DTYPE), b.astype(MXU_DTYPE),
                       preferred_element_type=jnp.float32)

    B, N, Din = node_feats.shape
    E = edge_feats.shape[-1]
    h = mm(node_feats.reshape(B * N, Din), w_pre).reshape(B, N, -1) + b_pre
    mask = adj[..., None] > 0.0                                    # [B, N, N, 1]
    for i in range(we_s.shape[0]):
        ee = mm(edge_feats.reshape(B * N * N, E), we_s[i]).reshape(B, N, N, -1) + be_s[i]
        msg = jnp.maximum(h[:, None, :, :] + ee, 0.0) + EPS_MSG
        logits = jnp.where(mask, msg, -1e30)
        mx = jnp.max(logits, axis=2, keepdims=True)
        ex = jnp.where(mask, jnp.exp(logits - mx), 0.0)
        denom = jnp.sum(ex, axis=2)
        num = jnp.sum(ex * msg, axis=2)
        agg = num / (denom + 1e-16)
        out = mm((h + agg).reshape(B * N, -1), wm_s[i]).reshape(B, N, -1) + bm_s[i] + h
        h = jnp.maximum(out * bns_s[i] + bnb_s[i], 0.0)
    pooled = jnp.mean(h, axis=1)
    return mm(pooled, w_out) + b_out


# ----------------------------------- main ----------------------------------- #

if __name__ == "__main__":
    B, N = 2, 8                         # batch of 2 graphs, 8 nodes each
    INP, EDGE, HID, NCLS = 16, 8, 32, 4
    NUM_LAYERS = 2

    key = jax.random.PRNGKey(0)
    keys = jax.random.split(key, 16)
    ki = iter(keys)

    # synthetic graph batch
    node_feats = jax.random.normal(next(ki), (B, N, INP), jnp.float32)
    edge_feats = jax.random.normal(next(ki), (B, N, N, EDGE), jnp.float32)
    adj = (jax.random.uniform(next(ki), (B, N, N)) < 0.4).astype(jnp.float32)

    def lin_init(k, fan_in, shape):
        bound = 1.0 / float(fan_in) ** 0.5
        return jax.random.uniform(k, shape, jnp.float32, -bound, bound)

    # pre_encoder Linear(inp_dim -> hid_dim)
    w_pre = lin_init(next(ki), INP, (INP, HID))
    b_pre = lin_init(next(ki), INP, (1, HID))

    # GENConv layers (stacked): edge encoder Linear(E->H), node MLP Linear(H->H), BN
    we_l, be_l, wm_l, bm_l, bns_l, bnb_l = [], [], [], [], [], []
    for _ in range(NUM_LAYERS):
        we_l.append(lin_init(next(ki), EDGE, (EDGE, HID)))
        be_l.append(lin_init(next(ki), EDGE, (1, HID)))
        wm_l.append(lin_init(next(ki), HID, (HID, HID)))
        bm_l.append(lin_init(next(ki), HID, (1, HID)))
        gamma = jnp.ones((1, HID), jnp.float32)
        beta = jnp.zeros((1, HID), jnp.float32)
        run_mean = jnp.zeros((1, HID), jnp.float32)   # fresh-init eval BN stats
        run_var = jnp.ones((1, HID), jnp.float32)
        scale = gamma / jnp.sqrt(run_var + BN_EPS)
        bns_l.append(scale)
        bnb_l.append(beta - run_mean * scale)
    we_s = jnp.stack(we_l)    # [L, E, H]
    be_s = jnp.stack(be_l)    # [L, 1, H]
    wm_s = jnp.stack(wm_l)    # [L, H, H]
    bm_s = jnp.stack(bm_l)    # [L, 1, H]
    bns_s = jnp.stack(bns_l)  # [L, 1, H]
    bnb_s = jnp.stack(bnb_l)  # [L, 1, H]

    # out_lay Linear(hid_dim -> num_classes)
    w_out = lin_init(next(ki), HID, (HID, NCLS))
    b_out = lin_init(next(ki), HID, (1, NCLS))

    args = (node_feats, edge_feats, adj, w_pre, b_pre,
            we_s, be_s, wm_s, bm_s, bns_s, bnb_s, w_out, b_out)

    out = jax.jit(deeper_gcn_forward)(*args)
    out = jax.block_until_ready(out)
    assert out.shape == (B, NCLS) and out.dtype == jnp.float32

    ref = _reference_forward(*args)
    err = float(jnp.max(jnp.abs(out - ref)))
    assert err < 2e-3, f"mismatch vs pure-JAX reference: {err}"

    print("KERNEL_OK")
</pallas_src>

<mosaic_0001>
module attributes {stable_mosaic.version = 11 : i64} {
  func.func @_dense_kernel(%arg0: i32, %arg1: memref<2x32xf32, #tpu.memory_space<vmem>>, %arg2: memref<32x4xf32, #tpu.memory_space<vmem>>, %arg3: memref<1x4xf32, #tpu.memory_space<vmem>>, %arg4: memref<2x4xf32, #tpu.memory_space<vmem>>) attributes {dimension_semantics = [#tpu.dimension_semantics<parallel>], iteration_bounds = array<i64: 1>, scalar_prefetch = 0 : i64, scratch_operands = 0 : i64, tpu.core_type = #tpu.core_type<tc>, window_params = [{transform_indices = @transform_0, window_bounds = array<i64: 2, 32>}, {pipeline_mode = #tpu.pipeline_mode<synchronous>, transform_indices = @transform_1, window_bounds = array<i64: 32, 4>}, {pipeline_mode = #tpu.pipeline_mode<synchronous>, transform_indices = @transform_2, window_bounds = array<i64: 1, 4>}, {transform_indices = @transform_3, window_bounds = array<i64: 2, 4>}]} {
    %c0 = arith.constant 0 : index
    %c0_0 = arith.constant 0 : index
    %0 = vector.load %arg1[%c0, %c0_0] : memref<2x32xf32, #tpu.memory_space<vmem>>, vector<2x32xf32>
    %1 = arith.truncf %0 : vector<2x32xf32> to vector<2x32xbf16>
    %c0_1 = arith.constant 0 : index
    %c0_2 = arith.constant 0 : index
    %2 = vector.load %arg2[%c0_1, %c0_2] : memref<32x4xf32, #tpu.memory_space<vmem>>, vector<32x4xf32>
    %3 = arith.truncf %2 : vector<32x4xf32> to vector<32x4xbf16>
    %cst = arith.constant dense<0.000000e+00> : vector<2x4xf32>
    %4 = tpu.matmul %1, %3, %cst {dimension_numbers = #tpu.dot_dimension_numbers<[1], [0], [0], [1], [0, 0, 1, 1], [], []>} : vector<2x32xbf16>, vector<32x4xbf16>, vector<2x4xf32> -> vector<2x4xf32>
    %c0_3 = arith.constant 0 : index
    %c0_4 = arith.constant 0 : index
    %5 = vector.load %arg3[%c0_3, %c0_4] : memref<1x4xf32, #tpu.memory_space<vmem>>, vector<1x4xf32>
    %6 = vector.broadcast %5 : vector<1x4xf32> to vector<2x4xf32>
    %7 = arith.addf %4, %6 : vector<2x4xf32>
    %c0_5 = arith.constant 0 : index
    %c0_6 = arith.constant 0 : index
    %8 = vector.load %arg4[%c0_5, %c0_6] : memref<2x4xf32, #tpu.memory_space<vmem>>, vector<2x4xf32>
    tpu.vector_store %arg4[%c0_5, %c0_6], %7 {strides = array<i32>} : memref<2x4xf32, #tpu.memory_space<vmem>>, vector<2x4xf32>,
    return
  }
  func.func @transform_0(%arg0: i32) -> (i32, i32) {
    %c0_i32 = arith.constant 0 : i32
    %c0_i32_0 = arith.constant 0 : i32
    return %arg0, %c0_i32 : i32, i32
  }
  func.func @transform_1(%arg0: i32) -> (i32, i32) {
    %c0_i32 = arith.constant 0 : i32
    %c0_i32_0 = arith.constant 0 : i32
    %c0_i32_1 = arith.constant 0 : i32
    return %c0_i32, %c0_i32_0 : i32, i32
  }
  func.func @transform_2(%arg0: i32) -> (i32, i32) {
    %c0_i32 = arith.constant 0 : i32
    %c0_i32_0 = arith.constant 0 : i32
    %c0_i32_1 = arith.constant 0 : i32
    return %c0_i32, %c0_i32_0 : i32, i32
  }
  func.func @transform_3(%arg0: i32) -> (i32, i32) {
    %c0_i32 = arith.constant 0 : i32
    %c0_i32_0 = arith.constant 0 : i32
    return %arg0, %c0_i32 : i32, i32
  }
}

module attributes {stable_mosaic.version = 11 : i64} {
  func.func @_fused_layers_pool_kernel(%arg0: i32, %arg1: i32, %arg2: i32, %arg3: memref<1x8x32xf32, #tpu.memory_space<vmem>>, %arg4: memref<1x64x8xf32, #tpu.memory_space<vmem>>, %arg5: memref<1x8x8xf32, #tpu.memory_space<vmem>>, %arg6: memref<1x8x32xf32, #tpu.memory_space<vmem>>, %arg7: memref<1x1x32xf32, #tpu.memory_space<vmem>>, %arg8: memref<1x32x32xf32, #tpu.memory_space<vmem>>, %arg9: memref<1x1x32xf32, #tpu.memory_space<vmem>>, %arg10: memref<1x1x32xf32, #tpu.memory_space<vmem>>, %arg11: memref<1x1x32xf32, #tpu.memory_space<vmem>>, %arg12: memref<1x1x32xf32, #tpu.memory_space<vmem>>, %arg13: memref<8x32xf32, #tpu.memory_space<vmem>>, %arg14: memref<8x32xf32, #tpu.memory_space<vmem>>, %arg15: memref<1x32xf32, #tpu.memory_space<vmem>>) attributes {dimension_semantics = [#tpu.dimension_semantics<parallel>, #tpu.dimension_semantics<arbitrary>, #tpu.dimension_semantics<arbitrary>], iteration_bounds = array<i64: 2, 2, 1>, scalar_prefetch = 0 : i64, scratch_operands = 3 : i64, tpu.core_type = #tpu.core_type<tc>, window_params = [{transform_indices = @transform_0, window_bounds = array<i64: 1, 8, 32>}, {transform_indices = @transform_1, window_bounds = array<i64: 1, 64, 8>}, {transform_indices = @transform_2, window_bounds = array<i64: 1, 8, 8>}, {transform_indices = @transform_3, window_bounds = array<i64: 1, 8, 32>}, {transform_indices = @transform_4, window_bounds = array<i64: 1, 1, 32>}, {transform_indices = @transform_5, window_bounds = array<i64: 1, 32, 32>}, {transform_indices = @transform_6, window_bounds = array<i64: 1, 1, 32>}, {transform_indices = @transform_7, window_bounds = array<i64: 1, 1, 32>}, {transform_indices = @transform_8, window_bounds = array<i64: 1, 1, 32>}, {transform_indices = @transform_9, window_bounds = array<i64: 1, 1, 32>}]} {
    %c0_i32 = arith.constant 0 : i32
    %0 = arith.cmpi eq, %arg1, %c0_i32 : i32
    %c0_i32_0 = arith.constant 0 : i32
    %1 = arith.cmpi eq, %arg2, %c0_i32_0 : i32
    %2 = arith.andi %0, %1 : i1
    %3 = arith.extui %2 : i1 to i32
    %c0_i32_1 = arith.constant 0 : i32
    %4 = arith.cmpi ne, %3, %c0_i32_1 : i32
    scf.if %4 {
      %c0_47 = arith.constant 0 : index
      %c0_48 = arith.constant 0 : index
      %c0_49 = arith.constant 0 : index
      %88 = vector.load %arg3[%c0_47, %c0_48, %c0_49] : memref<1x8x32xf32, #tpu.memory_space<vmem>>, vector<1x8x32xf32>
      %89 = vector.shape_cast %88 : vector<1x8x32xf32> to vector<8x32xf32>
      %c0_50 = arith.constant 0 : index
      %c0_51 = arith.constant 0 : index
      %90 = vector.load %arg13[%c0_50, %c0_51] : memref<8x32xf32, #tpu.memory_space<vmem>>, vector<8x32xf32>
      tpu.vector_store %arg13[%c0_50, %c0_51], %89 {strides = array<i32>} : memref<8x32xf32, #tpu.memory_space<vmem>>, vector<8x32xf32>,
    } else {
    }
    %c1_i32 = arith.constant 1 : i32
    %5 = arith.cmpi eq, %arg1, %c1_i32 : i32
    %c0_i32_2 = arith.constant 0 : i32
    %6 = arith.cmpi eq, %arg2, %c0_i32_2 : i32
    %7 = arith.andi %5, %6 : i1
    %8 = arith.extui %7 : i1 to i32
    %c0_i32_3 = arith.constant 0 : i32
    %9 = arith.cmpi ne, %8, %c0_i32_3 : i32
    scf.if %9 {
      %cst_47 = arith.constant 0.000000e+00 : f32
      %88 = vector.broadcast %cst_47 : f32 to vector<1x32xf32>
      %c0_48 = arith.constant 0 : index
      %c0_49 = arith.constant 0 : index
      %89 = vector.load %arg15[%c0_48, %c0_49] : memref<1x32xf32, #tpu.memory_space<vmem>>, vector<1x32xf32>
      tpu.vector_store %arg15[%c0_48, %c0_49], %88 {strides = array<i32>} : memref<1x32xf32, #tpu.memory_space<vmem>>, vector<1x32xf32>,
    } else {
    }
    %c8_i32 = arith.constant 8 : i32
    %10 = arith.muli %arg2, %c8_i32 : i32
    %11 = tpu.assume_multiple %10, 8 : i32
    %c0 = arith.constant 0 : index
    %c0_4 = arith.constant 0 : index
    %12 = vector.load %arg13[%c0, %c0_4] : memref<8x32xf32, #tpu.memory_space<vmem>>, vector<8x32xf32>
    %13 = arith.index_cast %11 : i32 to index
    %c0_5 = arith.constant 0 : index
    %14 = vector.load %arg13[%13, %c0_5] : memref<8x32xf32, #tpu.memory_space<vmem>>, vector<8x32xf32>
    %c0_6 = arith.constant 0 : index
    %c0_7 = arith.constant 0 : index
    %c0_8 = arith.constant 0 : index
    %15 = vector.load %arg4[%c0_6, %c0_7, %c0_8] : memref<1x64x8xf32, #tpu.memory_space<vmem>>, vector<1x64x8xf32>
    %16 = vector.shape_cast %15 : vector<1x64x8xf32> to vector<64x8xf32>
    %17 = arith.truncf %16 : vector<64x8xf32> to vector<64x8xbf16>
    %c0_9 = arith.constant 0 : index
    %c0_10 = arith.constant 0 : index
    %c0_11 = arith.constant 0 : index
    %18 = vector.load %arg6[%c0_9, %c0_10, %c0_11] : memref<1x8x32xf32, #tpu.memory_space<vmem>>, vector<1x8x32xf32>
    %19 = vector.shape_cast %18 : vector<1x8x32xf32> to vector<8x32xf32>
    %20 = arith.truncf %19 : vector<8x32xf32> to vector<8x32xbf16>
    %cst = arith.constant dense<0.000000e+00> : vector<64x32xf32>
    %21 = tpu.matmul %17, %20, %cst {dimension_numbers = #tpu.dot_dimension_numbers<[1], [0], [0], [1], [0, 0, 1, 1], [], []>} : vector<64x8xbf16>, vector<8x32xbf16>, vector<64x32xf32> -> vector<64x32xf32>
    %c0_12 = arith.constant 0 : index
    %c0_13 = arith.constant 0 : index
    %c0_14 = arith.constant 0 : index
    %22 = vector.load %arg7[%c0_12, %c0_13, %c0_14] : memref<1x1x32xf32, #tpu.memory_space<vmem>>, vector<1x1x32xf32>
    %23 = vector.shape_cast %22 : vector<1x1x32xf32> to vector<1x32xf32>
    %24 = vector.broadcast %23 : vector<1x32xf32> to vector<64x32xf32>
    %25 = arith.addf %21, %24 : vector<64x32xf32>
    %26 = vector.shape_cast %25 : vector<64x32xf32> to vector<8x8x32xf32>
    %27 = vector.shape_cast %12 : vector<8x32xf32> to vector<1x8x32xf32>
    %28 = vector.broadcast %27 : vector<1x8x32xf32> to vector<8x8x32xf32>
    %29 = arith.addf %28, %26 : vector<8x8x32xf32>
    %cst_15 = arith.constant 0.000000e+00 : f32
    %30 = vector.broadcast %cst_15 : f32 to vector<8x8x32xf32>
    %31 = arith.maximumf %29, %30 : vector<8x8x32xf32>
    %cst_16 = arith.constant 1.000000e-07 : f32
    %32 = vector.broadcast %cst_16 : f32 to vector<8x8x32xf32>
    %33 = arith.addf %31, %32 : vector<8x8x32xf32>
    %c0_17 = arith.constant 0 : index
    %c0_18 = arith.constant 0 : index
    %c0_19 = arith.constant 0 : index
    %34 = vector.load %arg5[%c0_17, %c0_18, %c0_19] : memref<1x8x8xf32, #tpu.memory_space<vmem>>, vector<1x8x8xf32>
    %35 = vector.shape_cast %34 : vector<1x8x8xf32> to vector<8x8xf32>
    %36 = vector.shape_cast %35 : vector<8x8xf32> to vector<8x8x1xf32>
    %37 = vector.broadcast %36 : vector<8x8x1xf32> to vector<8x8x32xf32>
    %38 = arith.mulf %33, %37 : vector<8x8x32xf32>
    %cst_20 = arith.constant dense<0xFF800000> : vector<8x32xf32>
    %39 = vector.multi_reduction <maximumf>, %38, %cst_20 [1] : vector<8x8x32xf32> to vector<8x32xf32>
    %40 = vector.shape_cast %39 : vector<8x32xf32> to vector<8x1x32xf32>
    %41 = vector.broadcast %40 : vector<8x1x32xf32> to vector<8x8x32xf32>
    %42 = arith.subf %33, %41 : vector<8x8x32xf32>
    %cst_21 = arith.constant 0.000000e+00 : f32
    %43 = vector.broadcast %cst_21 : f32 to vector<8x8x32xf32>
    %44 = arith.minimumf %42, %43 : vector<8x8x32xf32>
    %45 = math.exp %44 : vector<8x8x32xf32>
    %46 = vector.broadcast %36 : vector<8x8x1xf32> to vector<8x8x32xf32>
    %47 = arith.mulf %45, %46 : vector<8x8x32xf32>
    %cst_22 = arith.constant dense<0.000000e+00> : vector<8x32xf32>
    %48 = vector.multi_reduction <add>, %47, %cst_22 [1] : vector<8x8x32xf32> to vector<8x32xf32>
    %49 = arith.mulf %47, %33 : vector<8x8x32xf32>
    %cst_23 = arith.constant dense<0.000000e+00> : vector<8x32xf32>
    %50 = vector.multi_reduction <add>, %49, %cst_23 [1] : vector<8x8x32xf32> to vector<8x32xf32>
    %cst_24 = arith.constant 1.000000e-16 : f32
    %51 = vector.broadcast %cst_24 : f32 to vector<8x32xf32>
    %52 = arith.addf %48, %51 : vector<8x32xf32>
    %53 = arith.divf %50, %52 : vector<8x32xf32>
    %54 = arith.addf %14, %53 : vector<8x32xf32>
    %55 = arith.truncf %54 : vector<8x32xf32> to vector<8x32xbf16>
    %c0_25 = arith.constant 0 : index
    %c0_26 = arith.constant 0 : index
    %c0_27 = arith.constant 0 : index
    %56 = vector.load %arg8[%c0_25, %c0_26, %c0_27] : memref<1x32x32xf32, #tpu.memory_space<vmem>>, vector<1x32x32xf32>
    %57 = vector.shape_cast %56 : vector<1x32x32xf32> to vector<32x32xf32>
    %58 = arith.truncf %57 : vector<32x32xf32> to vector<32x32xbf16>
    %cst_28 = arith.constant dense<0.000000e+00> : vector<8x32xf32>
    %59 = tpu.matmul %55, %58, %cst_28 {dimension_numbers = #tpu.dot_dimension_numbers<[1], [0], [0], [1], [0, 0, 1, 1], [], []>} : vector<8x32xbf16>, vector<32x32xbf16>, vector<8x32xf32> -> vector<8x32xf32>
    %c0_29 = arith.constant 0 : index
    %c0_30 = arith.constant 0 : index
    %c0_31 = arith.constant 0 : index
    %60 = vector.load %arg9[%c0_29, %c0_30, %c0_31] : memref<1x1x32xf32, #tpu.memory_space<vmem>>, vector<1x1x32xf32>
    %61 = vector.shape_cast %60 : vector<1x1x32xf32> to vector<1x32xf32>
    %62 = vector.broadcast %61 : vector<1x32xf32> to vector<8x32xf32>
    %63 = arith.addf %59, %62 : vector<8x32xf32>
    %64 = arith.addf %63, %14 : vector<8x32xf32>
    %c0_32 = arith.constant 0 : index
    %c0_33 = arith.constant 0 : index
    %c0_34 = arith.constant 0 : index
    %65 = vector.load %arg10[%c0_32, %c0_33, %c0_34] : memref<1x1x32xf32, #tpu.memory_space<vmem>>, vector<1x1x32xf32>
    %66 = vector.shape_cast %65 : vector<1x1x32xf32> to vector<1x32xf32>
    %67 = vector.broadcast %66 : vector<1x32xf32> to vector<8x32xf32>
    %68 = arith.mulf %64, %67 : vector<8x32xf32>
    %c0_35 = arith.constant 0 : index
    %c0_36 = arith.constant 0 : index
    %c0_37 = arith.constant 0 : index
    %69 = vector.load %arg11[%c0_35, %c0_36, %c0_37] : memref<1x1x32xf32, #tpu.memory_space<vmem>>, vector<1x1x32xf32>
    %70 = vector.shape_cast %69 : vector<1x1x32xf32> to vector<1x32xf32>
    %71 = vector.broadcast %70 : vector<1x32xf32> to vector<8x32xf32>
    %72 = arith.addf %68, %71 : vector<8x32xf32>
    %cst_38 = arith.constant 0.000000e+00 : f32
    %73 = vector.broadcast %cst_38 : f32 to vector<8x32xf32>
    %74 = arith.maximumf %72, %73 : vector<8x32xf32>
    %75 = arith.index_cast %11 : i32 to index
    %c0_39 = arith.constant 0 : index
    %76 = vector.load %arg14[%75, %c0_39] : memref<8x32xf32, #tpu.memory_space<vmem>>, vector<8x32xf32>
    tpu.vector_store %arg14[%75, %c0_39], %74 {strides = array<i32>} : memref<8x32xf32, #tpu.memory_space<vmem>>, vector<8x32xf32>,
    %c1_i32_40 = arith.constant 1 : i32
    %77 = arith.cmpi eq, %arg1, %c1_i32_40 : i32
    %78 = arith.extui %77 : i1 to i32
    %c0_i32_41 = arith.constant 0 : i32
    %79 = arith.cmpi ne, %78, %c0_i32_41 : i32
    scf.if %79 {
      %c0_47 = arith.constant 0 : index
      %c0_48 = arith.constant 0 : index
      %88 = vector.load %arg15[%c0_47, %c0_48] : memref<1x32xf32, #tpu.memory_space<vmem>>, vector<1x32xf32>
      %cst_49 = arith.constant dense<0.000000e+00> : vector<32xf32>
      %89 = vector.multi_reduction <add>, %74, %cst_49 [0] : vector<8x32xf32> to vector<32xf32>
      %90 = vector.shape_cast %89 : vector<32xf32> to vector<1x32xf32>
      %91 = arith.addf %88, %90 : vector<1x32xf32>
      %c0_50 = arith.constant 0 : index
      %c0_51 = arith.constant 0 : index
      %92 = vector.load %arg15[%c0_50, %c0_51] : memref<1x32xf32, #tpu.memory_space<vmem>>, vector<1x32xf32>
      tpu.vector_store %arg15[%c0_50, %c0_51], %91 {strides = array<i32>} : memref<1x32xf32, #tpu.memory_space<vmem>>, vector<1x32xf32>,
    } else {
    }
    %c0_i32_42 = arith.constant 0 : i32
    %80 = arith.cmpi eq, %arg2, %c0_i32_42 : i32
    %81 = arith.extui %80 : i1 to i32
    %c0_i32_43 = arith.constant 0 : i32
    %82 = arith.cmpi ne, %81, %c0_i32_43 : i32
    scf.if %82 {
      %c0_47 = arith.constant 0 : index
      %c0_48 = arith.constant 0 : index
      %88 = vector.load %arg14[%c0_47, %c0_48] : memref<8x32xf32, #tpu.memory_space<vmem>>, vector<8x32xf32>
      %c0_49 = arith.constant 0 : index
      %c0_50 = arith.constant 0 : index
      %89 = vector.load %arg13[%c0_49, %c0_50] : memref<8x32xf32, #tpu.memory_space<vmem>>, vector<8x32xf32>
      tpu.vector_store %arg13[%c0_49, %c0_50], %88 {strides = array<i32>} : memref<8x32xf32, #tpu.memory_space<vmem>>, vector<8x32xf32>,
    } else {
    }
    %c1_i32_44 = arith.constant 1 : i32
    %83 = arith.cmpi eq, %arg1, %c1_i32_44 : i32
    %c0_i32_45 = arith.constant 0 : i32
    %84 = arith.cmpi eq, %arg2, %c0_i32_45 : i32
    %85 = arith.andi %83, %84 : i1
    %86 = arith.extui %85 : i1 to i32
    %c0_i32_46 = arith.constant 0 : i32
    %87 = arith.cmpi ne, %86, %c0_i32_46 : i32
    scf.if %87 {
      %c0_47 = arith.constant 0 : index
      %c0_48 = arith.constant 0 : index
      %88 = vector.load %arg15[%c0_47, %c0_48] : memref<1x32xf32, #tpu.memory_space<vmem>>, vector<1x32xf32>
      %cst_49 = arith.constant 1.250000e-01 : f32
      %89 = vector.broadcast %cst_49 : f32 to vector<1x32xf32>
      %90 = arith.mulf %88, %89 : vector<1x32xf32>
      %c0_50 = arith.constant 0 : index
      %c0_51 = arith.constant 0 : index
      %c0_52 = arith.constant 0 : index
      %91 = vector.load %arg12[%c0_50, %c0_51, %c0_52] : memref<1x1x32xf32, #tpu.memory_space<vmem>>, vector<1x1x32xf32>
      %92 = vector.shape_cast %91 : vector<1x1x32xf32> to vector<1x32xf32>
      %93 = vector.shape_cast %90 : vector<1x32xf32> to vector<1x1x32xf32>
      tpu.vector_store %arg12[%c0_50, %c0_51, %c0_52], %93 {strides = array<i32>} : memref<1x1x32xf32, #tpu.memory_space<vmem>>, vector<1x1x32xf32>,
    } else {
    }
    return
  }
  func.func @transform_0(%arg0: i32, %arg1: i32, %arg2: i32) -> (i32, i32, i32) {
    %c0_i32 = arith.constant 0 : i32
    %c0_i32_0 = arith.constant 0 : i32
    %c0_i32_1 = arith.constant 0 : i32
    return %arg0, %c0_i32, %c0_i32_0 : i32, i32, i32
  }
  func.func @transform_1(%arg0: i32, %arg1: i32, %arg2: i32) -> (i32, i32, i32) {
    %c0_i32 = arith.constant 0 : i32
    %c0_i32_0 = arith.constant 0 : i32
    return %arg0, %arg2, %c0_i32 : i32, i32, i32
  }
  func.func @transform_2(%arg0: i32, %arg1: i32, %arg2: i32) -> (i32, i32, i32) {
    %c0_i32 = arith.constant 0 : i32
    %c0_i32_0 = arith.constant 0 : i32
    return %arg0, %arg2, %c0_i32 : i32, i32, i32
  }
  func.func @transform_3(%arg0: i32, %arg1: i32, %arg2: i32) -> (i32, i32, i32) {
    %c0_i32 = arith.constant 0 : i32
    %c0_i32_0 = arith.constant 0 : i32
    %c0_i32_1 = arith.constant 0 : i32
    return %arg1, %c0_i32, %c0_i32_0 : i32, i32, i32
  }
  func.func @transform_4(%arg0: i32, %arg1: i32, %arg2: i32) -> (i32, i32, i32) {
    %c0_i32 = arith.constant 0 : i32
    %c0_i32_0 = arith.constant 0 : i32
    %c0_i32_1 = arith.constant 0 : i32
    return %arg1, %c0_i32, %c0_i32_0 : i32, i32, i32
  }
  func.func @transform_5(%arg0: i32, %arg1: i32, %arg2: i32) -> (i32, i32, i32) {
    %c0_i32 = arith.constant 0 : i32
    %c0_i32_0 = arith.constant 0 : i32
    %c0_i32_1 = arith.constant 0 : i32
    return %arg1, %c0_i32, %c0_i32_0 : i32, i32, i32
  }
  func.func @transform_6(%arg0: i32, %arg1: i32, %arg2: i32) -> (i32, i32, i32) {
    %c0_i32 = arith.constant 0 : i32
    %c0_i32_0 = arith.constant 0 : i32
    %c0_i32_1 = arith.constant 0 : i32
    return %arg1, %c0_i32, %c0_i32_0 : i32, i32, i32
  }
  func.func @transform_7(%arg0: i32, %arg1: i32, %arg2: i32) -> (i32, i32, i32) {
    %c0_i32 = arith.constant 0 : i32
    %c0_i32_0 = arith.constant 0 : i32
    %c0_i32_1 = arith.constant 0 : i32
    return %arg1, %c0_i32, %c0_i32_0 : i32, i32, i32
  }
  func.func @transform_8(%arg0: i32, %arg1: i32, %arg2: i32) -> (i32, i32, i32) {
    %c0_i32 = arith.constant 0 : i32
    %c0_i32_0 = arith.constant 0 : i32
    %c0_i32_1 = arith.constant 0 : i32
    return %arg1, %c0_i32, %c0_i32_0 : i32, i32, i32
  }
  func.func @transform_9(%arg0: i32, %arg1: i32, %arg2: i32) -> (i32, i32, i32) {
    %c0_i32 = arith.constant 0 : i32
    %c0_i32_0 = arith.constant 0 : i32
    %c0_i32_1 = arith.constant 0 : i32
    return %arg0, %c0_i32, %c0_i32_0 : i32, i32, i32
  }
}

module attributes {stable_mosaic.version = 11 : i64} {
  func.func @_dense_kernel(%arg0: i32, %arg1: memref<16x16xf32, #tpu.memory_space<vmem>>, %arg2: memref<16x32xf32, #tpu.memory_space<vmem>>, %arg3: memref<1x32xf32, #tpu.memory_space<vmem>>, %arg4: memref<16x32xf32, #tpu.memory_space<vmem>>) attributes {dimension_semantics = [#tpu.dimension_semantics<parallel>], iteration_bounds = array<i64: 1>, scalar_prefetch = 0 : i64, scratch_operands = 0 : i64, tpu.core_type = #tpu.core_type<tc>, window_params = [{transform_indices = @transform_0, window_bounds = array<i64: 16, 16>}, {pipeline_mode = #tpu.pipeline_mode<synchronous>, transform_indices = @transform_1, window_bounds = array<i64: 16, 32>}, {pipeline_mode = #tpu.pipeline_mode<synchronous>, transform_indices = @transform_2, window_bounds = array<i64: 1, 32>}, {transform_indices = @transform_3, window_bounds = array<i64: 16, 32>}]} {
    %c0 = arith.constant 0 : index
    %c0_0 = arith.constant 0 : index
    %0 = vector.load %arg1[%c0, %c0_0] : memref<16x16xf32, #tpu.memory_space<vmem>>, vector<16x16xf32>
    %1 = arith.truncf %0 : vector<16x16xf32> to vector<16x16xbf16>
    %c0_1 = arith.constant 0 : index
    %c0_2 = arith.constant 0 : index
    %2 = vector.load %arg2[%c0_1, %c0_2] : memref<16x32xf32, #tpu.memory_space<vmem>>, vector<16x32xf32>
    %3 = arith.truncf %2 : vector<16x32xf32> to vector<16x32xbf16>
    %cst = arith.constant dense<0.000000e+00> : vector<16x32xf32>
    %4 = tpu.matmul %1, %3, %cst {dimension_numbers = #tpu.dot_dimension_numbers<[1], [0], [0], [1], [0, 0, 1, 1], [], []>} : vector<16x16xbf16>, vector<16x32xbf16>, vector<16x32xf32> -> vector<16x32xf32>
    %c0_3 = arith.constant 0 : index
    %c0_4 = arith.constant 0 : index
    %5 = vector.load %arg3[%c0_3, %c0_4] : memref<1x32xf32, #tpu.memory_space<vmem>>, vector<1x32xf32>
    %6 = vector.broadcast %5 : vector<1x32xf32> to vector<16x32xf32>
    %7 = arith.addf %4, %6 : vector<16x32xf32>
    %c0_5 = arith.constant 0 : index
    %c0_6 = arith.constant 0 : index
    %8 = vector.load %arg4[%c0_5, %c0_6] : memref<16x32xf32, #tpu.memory_space<vmem>>, vector<16x32xf32>
    tpu.vector_store %arg4[%c0_5, %c0_6], %7 {strides = array<i32>} : memref<16x32xf32, #tpu.memory_space<vmem>>, vector<16x32xf32>,
    return
  }
  func.func @transform_0(%arg0: i32) -> (i32, i32) {
    %c0_i32 = arith.constant 0 : i32
    %c0_i32_0 = arith.constant 0 : i32
    return %arg0, %c0_i32 : i32, i32
  }
  func.func @transform_1(%arg0: i32) -> (i32, i32) {
    %c0_i32 = arith.constant 0 : i32
    %c0_i32_0 = arith.constant 0 : i32
    %c0_i32_1 = arith.constant 0 : i32
    return %c0_i32, %c0_i32_0 : i32, i32
  }
  func.func @transform_2(%arg0: i32) -> (i32, i32) {
    %c0_i32 = arith.constant 0 : i32
    %c0_i32_0 = arith.constant 0 : i32
    %c0_i32_1 = arith.constant 0 : i32
    return %c0_i32, %c0_i32_0 : i32, i32
  }
  func.func @transform_3(%arg0: i32) -> (i32, i32) {
    %c0_i32 = arith.constant 0 : i32
    %c0_i32_0 = arith.constant 0 : i32
    return %arg0, %c0_i32 : i32, i32
  }
}

</mosaic_0001>

<bundles_post_ra>
// kernel: deeper_gcn_forward.5
= control target key start
LH: loop header
LB: loop body
LE: loop exit
PB: predicated region body
PF: predicated region fallthrough
CT: control target
= control target key end

     0   :  { %s134_s0 = inlined_call_operand.vmem [shape: f32[2,32], index: 0, kind: input, shape index: {}]   ;;  %s135_s1 = inlined_call_operand.vmem [shape: f32[32,4], index: 1, kind: input, shape index: {}]   ;;  %s136_s2 = inlined_call_operand.vmem [shape: f32[1,4], index: 2, kind: input, shape index: {}]   ;;  %s137_s3 = inlined_call_operand.hbm [shape: f32[2,4], index: 3, kind: output, shape index: {}]  }
   0x1   :  { %v20_v0 = vld [vmem:[%s135_s1 + $0x10] sm:$0xff]  ;;  %v21_v1 = vld [vmem:[%s135_s1 + $0x18] sm:$0xff]  ;;  %v18_v2 = vld [vmem:[%s135_s1] sm:$0xff] }
   0x2   :  { %v23_v3 = vpack.c.bf16 %v21_v1, %v20_v0  ;;  %v19_v4 = vld [vmem:[%s135_s1 + $0x8] sm:$0xff] }
   0x3   :  { %8 = vsyncpa [#allocation3], 0  ;;  %v22_v5 = vpack.c.bf16 %v19_v4, %v18_v2  ;;  %v16_v6 = vld [vmem:[%s134_s0] sm:$0x3]  ;;  %vm28_vm0 = vcmask 261120   ;;  %s92_s24 = smov [#allocation2]  }
   0x4   :  { %38 = vmatpush.bf16.msra.mxu0 %v23_v3  ;;  %v17_v7 = vpack.c.bf16 %v16_v6, %v16_v6  ;;  %v65_v8 = vld [vmem:[%s136_s2] ss:$0 sm:$0xff]  ;;  %s52_s25 = sshll.u32 %s92_s24, 4  ;;  %s54_s1 = sshll.u32 %s137_s3, 4  ;;  %vm45_vm1 = vcmask 25600   ;;  %s53_s25 = int_to_ptr.vmem [resolvable:$true] %s52_s25  ;;  %s55_s1 = int_to_ptr.hbm [resolvable:$true] %s54_s1 }
   0x8   :  { %39 = vmatpush.bf16.msra.mxu0 %v22_v5 }
   0xb   :  { %63 = vmatmul.msk.bf16.vlgmr.msra.gmra.mxu0 %vm28_vm0, %v17_v7 }
  0x88   :  { %v41_v9 = vpop.f32.mrf.mxu0 }
  0x89   :  { %v42_v10 = vadd.f32 %v65_v8, %v41_v9 }
  0x8b   :  { %46 = vst.msk [vmem:[#allocation2] sm:$0x3] %vm45_vm1, %v42_v10 }
  0x8c   :  { %57 = dma.vmem_to_hbm [thread:$0]  %s53_s25, 32, %s55_s1, [#allocation3]  }
  0x90   :  { %v43_v11 = vpop.f32.mrf.mxu0 }
  0x91   :  { %90 = dma.done.wait [#allocation3], 32  }
  0x92   :  { %91 = vsyncadd [#allocation3], 4294967264 }
  0x93   :  { %62 = vsyncpa [#allocation3], 1 }

// kernel: deeper_gcn_forward.3
= control target key start
LH: loop header
LB: loop body
LE: loop exit
PB: predicated region body
PF: predicated region fallthrough
CT: control target
= control target key end

     0   :  { %8 = vsyncpa [#allocation3], 0  ;;  %s220_s0 = inlined_call_operand.hbm [shape: f32[16,16], index: 0, kind: input, shape index: {}]   ;;  %s221_s1 = inlined_call_operand.hbm [shape: f32[16,32], index: 1, kind: input, shape index: {}]   ;;  %s222_s2 = inlined_call_operand.hbm [shape: f32[1,32], index: 2, kind: input, shape index: {}]   ;;  %s223_s3 = inlined_call_operand.vmem [shape: f32[16,32], index: 3, kind: output, shape index: {}]  }
   0x1   :  { %9 = vsyncpa [#allocation5], 0  ;;  %s27_s14 = sshll.u32 %s221_s1, 4  ;;  %s180_s15 = smov [#allocation4]   ;;  %s28_s14 = int_to_ptr.hbm [resolvable:$true] %s27_s14 }
   0x2   :  { %s29_s16 = sshll.u32 %s180_s15, 4  ;;  %s14_s19 = sshll.u32 %s220_s0, 4  ;;  %s30_s16 = int_to_ptr.vmem [resolvable:$true] %s29_s16  ;;  %s15_s19 = int_to_ptr.hbm [resolvable:$true] %s14_s19 }
   0x3   :  { %s181_s20 = smov 128   ;;  %s182_s21 = smov 8  }
   0x4   :  { %35 = dma.hbm_to_vmem [thread:$0]  %s28_s14, 256, %s30_s16, [#allocation5], %s181_s20, %s181_s20, %s182_s21  }
   0x5   :  { %s183_s22 = smov [#allocation2]   ;;  %s41_s26 = sshll.u32 %s222_s2, 4  ;;  %s42_s26 = int_to_ptr.hbm [resolvable:$true] %s41_s26 }
   0x6   :  { %s16_s23 = sshll.u32 %s183_s22, 4  ;;  %s184_s1 = smov [#allocation6]   ;;  %s17_s23 = int_to_ptr.vmem [resolvable:$true] %s16_s23 }
   0x7   :  { %22 = dma.hbm_to_vmem [thread:$0]  %s15_s19, 256, %s17_s23, [#allocation3], %s181_s20, %s181_s20, %s182_s21  }
   0x8   :  { %s43_s27 = sshll.u32 %s184_s1, 4  ;;  %s44_s27 = int_to_ptr.vmem [resolvable:$true] %s43_s27 }
   0x9   :  { %46 = dma.hbm_to_vmem [thread:$0]  %s42_s26, 16, %s44_s27, [#allocation5]  }
   0xa   :  { %176 = dma.done.wait [#allocation3], 256  }
   0xb   :  { %177 = vsyncadd [#allocation3], 4294967040 }
   0xc   :  { %178 = dma.done.wait [#allocation5], 272  }
   0xd   :  { %179 = vsyncadd [#allocation5], 4294967024  ;;  %v63_v0 = vld [vmem:[#allocation4] sm:$0xff]  ;;  %v64_v1 = vld [vmem:[#allocation4 + $0x8] sm:$0xff]  ;;  %vm70_vm0 = vcmask 130048   ;;  %vm88_vm1 = vcmask 261120  }
   0xe   :  { %v60_v2 = vld [vmem:[#allocation2] sm:$0xff]  ;;  %v65_v3 = vpack.c.bf16 %v64_v1, %v63_v0  ;;  %v61_v4 = vld [vmem:[#allocation2 + $0x8] sm:$0xff] }
   0xf   :  { %v62_v5 = vpack.c.bf16 %v61_v4, %v60_v2  ;;  %v103_v6 = vld [vmem:[#allocation6] ss:$0 sm:$0xff] }
  0x10   :  { %81 = vmatpush.bf16.msra.mxu0 %v65_v3 }
  0x13   :  { %97 = vmatmul.msk.bf16.vlgmr.msra.gmra.mxu0 %vm70_vm0, %v62_v5 }
  0x90   :  { %v83_v7 = vpop.f32.mrf.mxu0 }
  0x91   :  { %v84_v8 = vadd.f32 %v103_v6, %v83_v7 }
  0x93   :  { %89 = vst.msk [vmem:[%s223_s3] sm:$0xff] %vm88_vm1, %v84_v8 }
  0x98   :  { %v85_v9 = vpop.f32.mrf.mxu0 }
  0x99   :  { %v86_v10 = vadd.f32 %v103_v6, %v85_v9 }
  0x9b   :  { %90 = vst.msk [vmem:[%s223_s3 + $0x8] sm:$0xff] %vm88_vm1, %v86_v10 }
  0x9c   :  { %95 = vsyncpa [#allocation3], 1 }
  0x9d   :  { %96 = vsyncpa [#allocation5], 1 }

// kernel: deeper_gcn_forward.4
= control target key start
LH: loop header
LB: loop body
LE: loop exit
PB: predicated region body
PF: predicated region fallthrough
CT: control target
= control target key end

     0   :  { %s2507_s0 = inlined_call_operand.vmem [shape: f32[2,8,32], index: 0, kind: input, shape index: {}]   ;;  %s2508_s1 = inlined_call_operand.hbm [shape: f32[2,64,8], index: 1, kind: input, shape index: {}]   ;;  %s2509_s2 = inlined_call_operand.hbm [shape: f32[2,8,8], index: 2, kind: input, shape index: {}]   ;;  %s2510_s3 = inlined_call_operand.hbm [shape: f32[2,8,32], index: 3, kind: input, shape index: {}]   ;;  %s2511_s4 = inlined_call_operand.vmem [shape: f32[2,1,32], index: 4, kind: input, shape index: {}]   ;;  %s2512_s5 = inlined_call_operand.hbm [shape: f32[2,32,32], index: 5, kind: input, shape index: {}]   ;;  %s2513_s6 = inlined_call_operand.vmem [shape: f32[2,1,32], index: 6, kind: input, shape index: {}]   ;;  %s2514_s7 = inlined_call_operand.vmem [shape: f32[2,1,32], index: 7, kind: input, shape index: {}]   ;;  %s2515_s8 = inlined_call_operand.vmem [shape: f32[2,1,32], index: 8, kind: input, shape index: {}]   ;;  %s2516_s9 = inlined_call_operand.vmem [shape: f32[2,1,32], index: 9, kind: output, shape index: {}]  }
   0x1   :  { %2529 = sst [smem:[#allocation26_spill]] %s2507_s0 }
   0x2   :  { %2530 = sst [smem:[#allocation27_spill]] %s2508_s1 }
   0x3   :  { %2531 = sst [smem:[#allocation28_spill]] %s2509_s2 }
   0x4   :  { %2532 = sst [smem:[#allocation29_spill]] %s2510_s3 }
   0x5   :  { %2533 = sst [smem:[#allocation30_spill]] %s2511_s4 }
   0x6   :  { %2534 = sst [smem:[#allocation31_spill]] %s2512_s5 }
   0x7   :  { %2535 = sst [smem:[#allocation32_spill]] %s2513_s6 }
   0x8   :  { %2536 = sst [smem:[#allocation33_spill]] %s2514_s7 }
   0x9   :  { %2537 = sst [smem:[#allocation34_spill]] %s2515_s8 }
   0xa   :  { %2538 = sst [smem:[#allocation35_spill]] %s2516_s9 }
   0xb   :  { %14 = vsyncpa [#allocation6], 0 }
   0xc   :  { %16 = vsyncpa [#allocation6 + $0x1], 0 }
   0xd   :  { %17 = vsyncpa [#allocation8], 0 }
   0xe   :  { %19 = vsyncpa [#allocation8 + $0x1], 0 }
   0xf   :  { %20 = vsyncpa [#allocation11], 0 }
  0x10   :  { %22 = vsyncpa [#allocation11 + $0x1], 0  ;;  %s1837_s30 = smov 0   ;;  %s1839_s10 = smov 0  }
  0x11   :  { %s1841_s11 = smov 0   ;;  %s1843_s12 = smov 0  }
  0x12   :  { %s1845_s13 = smov 0   ;;  %s1847_s14 = smov 0  }
  0x13   :  { %s1849_s15 = smov 0   ;;  %s1851_s16 = smov 0  }
  0x14   :  { %s1853_s17 = smov 0   ;;  %s1855_s18 = smov 0  }
  0x15   :  { %s1857_s19 = smov 0  }
  0x16 LB: > { %2539 = sst [smem:[#allocation16_spill]] %s1750_s11  ;;  %s2517_s20 = sadd.s32 4294967295, %s1782_s19   ;;  %s1782_s19 = sphi %s1857_s19, %s28_s19   ;;  %s1778_s18 = sphi %s1855_s18, %s2613_s18   ;;  %s1774_s17 = sphi %s1853_s17, %s2612_s17   ;;  %s1770_s16 = sphi %s1851_s16, %s2611_s16   ;;  %s1766_s15 = sphi %s1849_s15, %s2610_s15   ;;  %s1762_s14 = sphi %s1847_s14, %s2609_s14   ;;  %s1758_s13 = sphi %s1845_s13, %s2608_s13   ;;  %s1754_s12 = sphi %s1843_s12, %s2607_s12   ;;  %s1750_s11 = sphi %s1841_s11, %s2606_s11   ;;  %s1746_s10 = sphi %s1839_s10, %s2615_s10   ;;  %s1742_s30 = sphi %s1837_s30, %s2614_s30  }
  0x17   : > { %2540 = sst [smem:[#allocation17_spill]] %s1758_s13  ;;  %p89_p0 = scmp.ne.s32.totalorder %s1762_s14, %s1758_s13 }
  0x18   : > { %2541 = sst [smem:[#allocation18_spill]] %s1762_s14  ;;  %p90_p1 = scmp.eq.s32.totalorder %s1782_s19, 0 }
  0x19   : > { %2542 = sst [smem:[#allocation19_spill]] %s1766_s15  ;;  %p95_p2 = scmp.ne.s32.totalorder %s1758_s13, %s1754_s12 }
  0x1a   : > { %2543 = sst [smem:[#allocation20_spill]] %s1774_s17  ;;  %p96_p3 = scmp.eq.s32.totalorder %s2517_s20, 0 }
  0x1b   : > { %2544 = sst [smem:[#allocation21_spill]] %s1778_s18  ;;  %p143_p4 = scmp.ne.s32.totalorder %s1750_s11, %s1746_s10 }
  0x1c   : > { %p91_p5 = por %p90_p1, %p89_p0  ;;  %p149_p6 = scmp.ne.s32.totalorder %s1746_s10, %s1742_s30 }
  0x1d   : > { %p1900_p7 = por %p96_p3, %p95_p2  ;;  %p1904_p8 = por %p143_p4, %p90_p1 }
  0x1e   : > { %p1908_p9 = por %p149_p6, %p96_p3  ;;  %p1429_p10 = scmp.lt.s32.totalorder %s1782_s19, 4 }
  0x1f   : > { %s1914_s26 = sand.u32 1, %s1762_s14   ;;  %s360_s28 = sand.u32 1, %s1782_s19  }
  0x20   : > { %s1376_s27 = sshll.u32 %s1914_s26, 6  ;;  %p1920_p11 = pnand %p1429_p10, %p91_p5 }
  0x21   : > { %s1379_s30 = sshll.u32 %s1914_s26, 3  ;;  %s1380_s12 = sshll.u32 %s1778_s18, 3 }
  0x22   : > { %s2549_s2 = sld [smem:[#allocation28_spill]]  ;;  %s364_s8 = scalar_lea.vmem [#allocation7], %s1379_s30 }
  0x23   : > { %s373_s7 = sshll.u32 %s364_s8, 4  ;;  %p1933_p12 = pnand %p1429_p10, %p1904_p8  ;;  %s374_s7 = int_to_ptr.vmem [resolvable:$true] %s373_s7 }
  0x24   : > { %s1937_s0 = scalar_lea.sflag [#allocation8], %s360_s28  ;;  %p1386_p13 = scmp.ge.s32.totalorder %s1782_s19, 1 }
  0x25   : > { %p443_p0 = scmp.lt.s32.totalorder %s1782_s19, 5  ;;  %s1402_s20 = sshll.u32 %s1778_s18, 6 }
  0x26   : > { %s2552_s1 = sld [smem:[#allocation27_spill]]  ;;  %s1382_s30 = sshll.u32 %s1774_s17, 3 }
  0x27   : > { %p1944_p1 = pnand %p1386_p13, %p443_p0  ;;  %s2555_s3 = sld [smem:[#allocation29_spill]] }
  0x28   : > { %s369_s21 = scalar_lea.hbm %s2549_s2, %s1380_s12  ;;  %s2518_s12 = smov 128  }
  0x29   : > { %s371_s6 = sshll.u32 %s369_s21, 4  ;;  %s340_s21 = scalar_lea.vmem [#allocation5], %s1376_s27  ;;  %s372_s6 = int_to_ptr.hbm [resolvable:$true] %s371_s6 }
  0x2a   : > { %1422 = dma.hbm_to_vmem [thread:$0]  (!%p1920_p11), %s372_s6, 128, %s374_s7, %s1937_s0  }
  0x2b   : > { %s350_s22 = sshll.u32 %s340_s21, 4  ;;  %s337_s7 = scalar_lea.sflag [#allocation6], %s1914_s26  ;;  %s351_s22 = int_to_ptr.vmem [resolvable:$true] %s350_s22 }
  0x2c   : > { %s347_s28 = scalar_lea.hbm %s2552_s1, %s1402_s20  ;;  %s2519_s2 = smov 8  }
  0x2d   : > { %s348_s6 = sshll.u32 %s347_s28, 4  ;;  %s136_s27 = sadd.s32 1, %s1750_s11  ;;  %s349_s6 = int_to_ptr.hbm [resolvable:$true] %s348_s6 }
  0x2e   : > { %1419 = dma.hbm_to_vmem [thread:$0]  (!%p1920_p11), %s349_s6, 1024, %s351_s22, %s337_s7, %s2518_s12, %s2518_s12, %s2519_s2  }
  0x2f   : > { %s1960_s21 = sand.u32 1, %s1750_s11   ;;  %s43_s20 = sadd.s32 1, %s1774_s17 }
  0x30   : > { %s1381_s24 = sshll.u32 %s1960_s21, 3  ;;  %p45_p2 = scmp.ge.s32.totalorder %s43_s20, 2 }
  0x31   : > { %s384_s26 = scalar_lea.vmem [#allocation9], %s1381_s24  ;;  %s2554_s22 = sadd.s32 1, %s1778_s18 }
  0x32   : > { %s392_s29 = sshll.u32 %s384_s26, 4  ;;  %s2617_s20 = smov (%p45_p2, %s43_s20), 0  ;;  %s393_s29 = int_to_ptr.vmem [resolvable:$true] %s392_s29 }
  0x33   : > { %2553 = sst [smem:[#allocation22_spill]] %s2617_s20  ;;  %s2619_s22 = smov (!%p45_p2, %s2554_s22), %s1778_s18 }
  0x34   : > { %s133_s28 = ssub.s32 %s1774_s17, %s2617_s20  ;;  %s388_s12 = scalar_lea.hbm %s2555_s3, %s1382_s30 }
  0x35   : > { %p49_p3 = scmp.ge.s32.totalorder %s2619_s22, 2  ;;  %p134_p4 = scmp.eq.s32.totalorder %s133_s28, 0 }
  0x36   : > { %s390_s2 = sshll.u32 %s388_s12, 4  ;;  %s2558_s1 = sadd.s32 1, %s1762_s14  ;;  %s391_s2 = int_to_ptr.hbm [resolvable:$true] %s390_s2 }
  0x37   : > { %s2621_s22 = smov (%p49_p3, %s2619_s22), 0  ;;  %s1383_s30 = sshll.u32 %s1960_s21, 5 }
  0x38   : > { %2556 = sst [smem:[#allocation23_spill]] %s2621_s22  ;;  %s77_s26 = ssub.s32 %s1778_s18, %s2621_s22 }
  0x39   : > { %s1978_s24 = scalar_select %p134_p4, %s1750_s11, %s136_s27  }
  0x3a   : > { %p80_p5 = scmp.eq.s32.totalorder %s77_s26, 0  ;;  %s1403_s6 = sshll.u32 %s1774_s17, 5 }
  0x3b   : > { %2557 = sst [smem:[#allocation24_spill]] %s1978_s24  ;;  %s409_s9 = scalar_lea.vmem [#allocation10], %s1383_s30 }
  0x3c   : > { %1425 = dma.hbm_to_vmem [thread:$0]  (!%p1933_p12), %s391_s2, 128, %s393_s29, %s1937_s0  }
  0x3d   : > { %s1988_s20 = scalar_select %p80_p5, %s1762_s14, %s2558_s1  }
  0x3e   : > { %s2560_s5 = sld [smem:[#allocation31_spill]]  ;;  %s417_s15 = sshll.u32 %s409_s9, 4  ;;  %s418_s15 = int_to_ptr.vmem [resolvable:$true] %s417_s15 }
  0x3f   : > { %2559 = sst [smem:[#allocation25_spill]] %s1988_s20  ;;  %s406_s27 = scalar_lea.sflag [#allocation11], %s1960_s21 }
  0x40   : > { %s2561_s22 = smov 8   ;;  %s2562_s26 = smov 128  }
  0x41   : > { %s449_s0 = sand.u32 (!%p1944_p1), 1, %s1758_s13  }
  0x42   : > { %447 = sbr.rel (%p1944_p1) target bundleno = 526 (0x20e), region = 56  ;;  %s1387_s1 = sshll.u32 (!%p1944_p1), %s449_s0, 6 }
  0x43   : > { %s450_s2 = scalar_lea.sflag (!%p1944_p1), [#allocation6], %s449_s0  ;;  %s2004_s29 = scalar_lea.vmem (!%p1944_p1), [#allocation5], %s1387_s1 }
  0x44   : > { %s414_s7 = scalar_lea.hbm %s2560_s5, %s1403_s6 }
  0x45   : > { %s415_s3 = sshll.u32 %s414_s7, 4  ;;  %s416_s3 = int_to_ptr.hbm [resolvable:$true] %s415_s3 }
  0x46   : > { %1428 = dma.hbm_to_vmem [thread:$0]  (!%p1933_p12), %s416_s3, 512, %s418_s15, %s406_s27, %s2562_s26, %s2562_s26, %s2561_s22  }
  0x47   : > { %1725 = dma.done.wait (%p1900_p7), %s450_s2, 1024  }
  0x48   : > { %1727 = vsyncadd (%p1900_p7), %s450_s2, 4294966272  ;;  %s2563_s4 = sadd.s32 4294967295, %s1782_s19   ;;  %s1388_s3 = sshll.u32 %s449_s0, 3 }
  0x49   : > { %s459_s9 = sand.u32 1, %s2563_s4   ;;  %s2012_s8 = scalar_lea.vmem [#allocation7], %s1388_s3 }
  0x4a   : > { %s460_s15 = scalar_lea.sflag [#allocation8], %s459_s9 }
  0x4b   : > { %1729 = dma.done.wait (%p1900_p7), %s460_s15, 128  }
  0x4c   : > { %1731 = vsyncadd (%p1900_p7), %s460_s15, 4294967168  ;;  %s471_s21 = sand.u32 1, %s1746_s10  }
  0x4d   : > { %s1389_s22 = sshll.u32 %s471_s21, 3 }
  0x4e   : > { %s2019_s30 = scalar_lea.vmem [#allocation9], %s1389_s22 }
  0x4f   : > { %1733 = dma.done.wait (%p1908_p9), %s460_s15, 128  }
  0x50   : > { %1735 = vsyncadd (%p1908_p9), %s460_s15, 4294967168  ;;  %s1390_s6 = sshll.u32 %s471_s21, 5  ;;  %s480_s28 = scalar_lea.sflag [#allocation11], %s471_s21 }
  0x51   : > { %s2025_s12 = scalar_lea.vmem [#allocation10], %s1390_s6 }
  0x52   : > { %1737 = dma.done.wait (%p1908_p9), %s480_s28, 512  }
  0x53   : > { %1739 = vsyncadd (%p1908_p9), %s480_s28, 4294966784  ;;  %s2564_s23 = sld [smem:[#allocation19_spill]]  ;;  %p548_p6 = scmp.lt.s32.totalorder %s1770_s16, 1 }
  0x54   : > { %s2565_s26 = sld [smem:[#allocation35_spill]] }
  0x55   : > { %s2623_s16 = smov (!%p548_p6, %s1770_s16), 1  ;;  %s2566_s4 = sld [smem:[#allocation26_spill]] }
  0x56   : > { %s1391_s25 = sshll.u32 %s2623_s16, 3  ;;  %s2567_s21 = sld [smem:[#allocation30_spill]] }
  0x57   : > { %s2568_s5 = sld [smem:[#allocation32_spill]] }
  0x58   : > { %s2569_s14 = sld [smem:[#allocation33_spill]] }
  0x59   : > { %p553_p7 = scmp.lt.s32.totalorder %s2564_s23, 1  ;;  %p569_p8 = scmp.eq.s32.totalorder %s2564_s23, 0 }
  0x5a   : > { %s567_s0 = scalar_lea.vmem %s2565_s26, %s2623_s16  ;;  %s2570_s7 = sld [smem:[#allocation34_spill]]  ;;  %vm576_vm0 = vcmask (%p569_p8), 261120  }
  0x5b   : > { %s2625_s23 = smov (!%p553_p7, %s2564_s23), 1  ;;  %s551_s9 = scalar_lea.vmem %s2566_s4, %s1391_s25 }
  0x5c   : > { %s555_s22 = scalar_lea.vmem %s2567_s21, %s2625_s23  ;;  %574 = sbr.rel (!%p569_p8) target bundleno = 97 (0x61), region = 76  ;;  %v575_v0 = vld [vmem:[%s551_s9] sm:$0xff] (%p569_p8) }
  0x5d   : > { %s558_s18 = scalar_lea.vmem %s2568_s5, %s2625_s23  ;;  %577 = vst.msk [vmem:[#allocation2] sm:$0xff] (%p569_p8), %vm576_vm0, %v575_v0 }
  0x5e   : > { %s561_s13 = scalar_lea.vmem %s2569_s14, %s2625_s23 }
  0x60   : > { %s564_s27 = scalar_lea.vmem %s2570_s7, %s2625_s23 }
  0x61 PF: > { %s2571_s25 = sld [smem:[#allocation19_spill]] }
  0x67   : > { %p578_p9 = scmp.eq.s32.totalorder %s2571_s25, 1 }
  0x68   : > { %vm583_vm1 = vcmask (%p578_p9), 253952   ;;  %v1786_v1 = vmov (%p578_p9), 0.0  }
  0x69   : > { %582 = sbr.rel (!%p578_p9) target bundleno = 110 (0x6e), region = 80  ;;  %584 = vst.msk [vmem:[#allocation4] sm:$0x1] (%p578_p9), %vm583_vm1, %v1786_v1 }
  0x6e PF: > { %v601_v2 = vld [vmem:[%s2019_s30] sm:$0xff]  ;;  %vm620_vm2 = vcmask 1043456   ;;  %v589_v3 = vld [vmem:[%s2004_s29] sm:$0xff]  ;;  %v590_v4 = vld [vmem:[%s2004_s29 + $0x8] sm:$0xff]  ;;  %v679_v5 = vlaneseq  ;;  %vm607_vm3 = vcmask 64512   ;;  %vm742_vm4 = vcmask 261120  }
  0x6f   : > { %v602_v6 = vpack.c.bf16 %v601_v2, %v601_v2  ;;  %v591_v7 = vld [vmem:[%s2004_s29 + $0x10] sm:$0xff]  ;;  %v592_v8 = vld [vmem:[%s2004_s29 + $0x18] sm:$0xff]  ;;  %v597_v13 = vpack.c.bf16 %v590_v4, %v589_v3  ;;  %v677_v16 = vld [vmem:[%s2012_s8] sm:$0xff] }
  0x70   : > { %v595_v9 = vld [vmem:[%s2004_s29 + $0x30] sm:$0xff]  ;;  %v596_v10 = vld [vmem:[%s2004_s29 + $0x38] sm:$0xff]  ;;  %v680_v11 = vshrl.u32 %v679_v5, 7  ;;  %v598_v14 = vpack.c.bf16 %v592_v8, %v591_v7  ;;  %v678_v17 = vperm.slane %v677_v16, 0  ;;  %v692_v18 = vperm.slane %v677_v16, 2  ;;  %v593_v20 = vld [vmem:[%s2004_s29 + $0x20] sm:$0xff] }
  0x71   : > { %v622_v12 = vsel %vm620_vm2, %v602_v6, 0  ;;  %v600_v15 = vpack.c.bf16 %v596_v10, %v595_v9  ;;  %v706_v19 = vperm.slane %v677_v16, 4  ;;  %v594_v21 = vld [vmem:[%s2004_s29 + $0x28] sm:$0xff]  ;;  %v685_v22 = vperm.slane %v677_v16, 1 }
  0x72   : > { %631 = vmatpush.bf16.msra.mxu0 %v622_v12  ;;  %1406 = vmatpush.bf16.msra.mxu2 %v622_v12  ;;  %v699_v23 = vperm.slane %v677_v16, 3  ;;  %v713_v24 = vperm.slane %v677_v16, 5  ;;  %v599_v25 = vpack.c.bf16 %v594_v21, %v593_v20  ;;  %v720_v26 = vperm.slane %v677_v16, 6  ;;  %v2088_v29 = vld [vmem:[%s555_s22] ss:$0 sm:$0xff] }
  0x73   : > { %1407 = vmatpush.bf16.msra.mxu3 %v622_v12  ;;  %1521 = vset.pattern.permute.xlu0 %v680_v11  ;;  %v727_v27 = vperm.slane %v677_v16, 7  ;;  %v2090_v30 = vld [vmem:[#allocation2] sm:$0xff] }
  0x74   : > { %1522 = vset.pattern.permute.xlu1 %v680_v11  ;;  %1523 = vset.pattern.permute.xlu2 %v680_v11 }
  0x75   : > { %1394 = vmatmul.msk.bf16.vlgmr.msra.gmra.mxu0 %vm607_vm3, %v597_v13  ;;  %1395 = vmatmul.msk.bf16.vlgmr.msra.gmra.mxu2 %vm607_vm3, %v598_v14 }
  0x76   : > { %1397 = vmatmul.msk.bf16.vlgmr.msra.gmra.mxu3 %vm607_vm3, %v600_v15 }
  0x7b   : > { %683 = vperm.xlu0 %1521, %v678_v17  }
  0x7c   : > { %697 = vperm.xlu1 %1522, %v692_v18   ;;  %711 = vperm.xlu2 %1523, %v706_v19  }
  0x83   : > { %690 = vperm.xlu0 %1521, %v685_v22  }
  0x84   : > { %704 = vperm.xlu1 %1522, %v699_v23   ;;  %718 = vperm.xlu2 %1523, %v713_v24  }
  0x85   : > { %1396 = vmatmul.msk.bf16.gmra.mxu2 %vm607_vm3, %v599_v25 }
  0x8b   : > { %725 = vperm.xlu0 %1521, %v720_v26  }
  0x8c   : > { %732 = vperm.xlu1 %1522, %v727_v27  }
  0xed   : > { %v2081_v28 = vpop.permute.xlu0 %683 }
  0xee   : > { %v2094_v34 = vpop.permute.xlu1 %697 }
  0xf2   : > { %v633_v31 = vpop.f32.mrf.mxu0 }
  0xf3   : > { %v634_v32 = vadd.f32 %v2088_v29, %v633_v31 }
  0xf5   : > { %v653_v33 = vadd.f32 %v634_v32, %v2090_v30  ;;  %v2096_v35 = vpop.permute.xlu0 %690 }
  0xf6   : > { %v2111_v54 = vpop.permute.xlu1 %704 }
  0xf7   : > { %v661_v36 = vmax.f32 %v653_v33, 0.0 }
  0xf8   : > { %v638_v37 = vpop.f32.mrf.mxu2 }
  0xf9   : > { %v2098_v38 = vadd.f32 1e-07, %v661_v36  ;;  %v639_v39 = vadd.f32 %v2088_v29, %v638_v37  ;;  %v648_v40 = vpop.f32.mrf.mxu3 }
  0xfa   : > { %v649_v41 = vadd.f32 %v2088_v29, %v648_v40  ;;  %v635_v42 = vpop.f32.mrf.mxu0 }
  0xfb   : > { %v734_v43 = vmul.f32 %v2081_v28, %v2098_v38  ;;  %v655_v44 = vadd.f32 %v639_v39, %v2090_v30  ;;  %v636_v45 = vadd.f32 %v2088_v29, %v635_v42 }
  0xfc   : > { %v659_v46 = vadd.f32 %v649_v41, %v2090_v30 }
  0xfd   : > { %v743_v47 = vsel %vm742_vm4, %v734_v43, -inf  ;;  %v663_v48 = vmax.f32 %v655_v44, 0.0  ;;  %v654_v49 = vadd.f32 %v636_v45, %v2090_v30  ;;  %v2113_v55 = vpop.permute.xlu0 %725 }
  0xfe   : > { %v744_v50 = vrot.slane %v743_v47, 4  ;;  %v667_v51 = vmax.f32 %v659_v46, 0.0  ;;  %v2138_v19 = vpop.permute.xlu1 %732 }
  0xff   : > { %v2109_v52 = vadd.f32 1e-07, %v663_v48  ;;  %v662_v53 = vmax.f32 %v654_v49, 0.0 }
 0x100   : > { %v2115_v56 = vadd.f32 1e-07, %v667_v51  ;;  %v640_v57 = vpop.f32.mrf.mxu2  ;;  %v745_v62 = vmax.f32 %v743_v47, %v744_v50 }
 0x101   : > { %v736_v58 = vmul.f32 %v2094_v34, %v2109_v52  ;;  %v2119_v59 = vadd.f32 1e-07, %v662_v53  ;;  %v641_v60 = vadd.f32 %v2088_v29, %v640_v57  ;;  %v650_v61 = vpop.f32.mrf.mxu3 }
 0x102   : > { %v740_v63 = vmul.f32 %v2113_v55, %v2115_v56  ;;  %v651_v0 = vadd.f32 %v2088_v29, %v650_v61  ;;  %v746_v10 = vrot.slane %v745_v62, 2 }
 0x103   : > { %v757_v1 = vsel %vm742_vm4, %v736_v58, -inf  ;;  %v735_v2 = vmul.f32 %v2096_v35, %v2119_v59  ;;  %v656_v3 = vadd.f32 %v641_v60, %v2090_v30 }
 0x104   : > { %v758_v4 = vrot.slane %v757_v1, 4  ;;  %v785_v5 = vsel %vm742_vm4, %v740_v63, -inf  ;;  %v660_v6 = vadd.f32 %v651_v0, %v2090_v30  ;;  %v747_v20 = vmax.f32 %v745_v62, %v746_v10  ;;  %v2152_v10 = vpop.permute.xlu2 %711 }
 0x105   : > { %v750_v7 = vsel %vm742_vm4, %v735_v2, -inf  ;;  %v786_v8 = vrot.slane %v785_v5, 4  ;;  %v664_v9 = vmax.f32 %v656_v3, 0.0 }
 0x106   : > { %v759_v11 = vmax.f32 %v757_v1, %v758_v4  ;;  %v751_v12 = vrot.slane %v750_v7, 4  ;;  %v668_v13 = vmax.f32 %v660_v6, 0.0  ;;  %v748_v27 = vrot.slane %v747_v20, 1 }
 0x107   : > { %v2132_v14 = vadd.f32 1e-07, %v664_v9  ;;  %v787_v17 = vmax.f32 %v785_v5, %v786_v8 }
 0x108   : > { %v752_v15 = vmax.f32 %v750_v7, %v751_v12  ;;  %v2134_v16 = vadd.f32 1e-07, %v668_v13  ;;  %v760_v21 = vrot.slane %v759_v11, 2  ;;  %v643_v36 = vpop.f32.mrf.mxu2  ;;  %v749_v40 = vmax.f32 %v747_v20, %v748_v27 }
 0x109   : > { %v737_v18 = vmul.f32 %v2111_v54, %v2132_v14  ;;  %v788_v25 = vrot.slane %v787_v17, 2  ;;  %v644_v44 = vadd.f32 %v2088_v29, %v643_v36 }
 0x10a   : > { %v753_v22 = vrot.slane %v752_v15, 2  ;;  %v741_v24 = vmul.f32 %v2138_v19, %v2134_v16  ;;  %v761_v31 = vmax.f32 %v759_v11, %v760_v21  ;;  %v799_v47 = vsub.f32 %v2098_v38, %v749_v40 }
 0x10b   : > { %v764_v23 = vsel %vm742_vm4, %v737_v18, -inf  ;;  %v789_v37 = vmax.f32 %v787_v17, %v788_v25  ;;  %v657_v51 = vadd.f32 %v644_v44, %v2090_v30 }
 0x10c   : > { %v765_v26 = vrot.slane %v764_v23, 4  ;;  %v754_v32 = vmax.f32 %v752_v15, %v753_v22  ;;  %v792_v33 = vsel %vm742_vm4, %v741_v24, -inf  ;;  %v762_v41 = vrot.slane %v761_v31, 1 }
 0x10d   : > { %v793_v43 = vrot.slane %v792_v33, 4  ;;  %v790_v45 = vrot.slane %v789_v37, 1  ;;  %v807_v58 = vmin.f32 %v799_v47, 0.0  ;;  %v665_v63 = vmax.f32 %v657_v51, 0.0 }
 0x10e   : > { %v766_v39 = vmax.f32 %v764_v23, %v765_v26  ;;  %v755_v42 = vrot.slane %v754_v32, 1  ;;  %v763_v48 = vmax.f32 %v761_v31, %v762_v41 }
 0x10f   : > { %v794_v50 = vmax.f32 %v792_v33, %v793_v43  ;;  %v791_v53 = vmax.f32 %v789_v37, %v790_v45  ;;  %v815_v2 = vmul.f32 1.442695, %v807_v58  ;;  %v2150_v6 = vadd.f32 1e-07, %v665_v63 }
 0x110   : > { %v767_v46 = vrot.slane %v766_v39, 2  ;;  %v756_v49 = vmax.f32 %v754_v32, %v755_v42  ;;  %v801_v60 = vsub.f32 %v2109_v52, %v763_v48  ;;  %v645_v24 = vpop.f32.mrf.mxu2 }
 0x111   : > { %v795_v62 = vrot.slane %v794_v50, 2  ;;  %v805_v0 = vsub.f32 %v2115_v56, %v791_v53  ;;  %1528 = vpow2.f32 %v815_v2  ;;  %v738_v13 = vmul.f32 %v2152_v10, %v2150_v6 }
 0x112   : > { %v768_v57 = vmax.f32 %v766_v39, %v767_v46  ;;  %v800_v61 = vsub.f32 %v2119_v59, %v756_v49  ;;  %v809_v3 = vmin.f32 %v801_v60, 0.0  ;;  %v646_v33 = vadd.f32 %v2088_v29, %v645_v24 }
 0x113   : > { %v796_v5 = vmax.f32 %v794_v50, %v795_v62  ;;  %v813_v7 = vmin.f32 %v805_v0, 0.0  ;;  %v771_v20 = vsel %vm742_vm4, %v738_v13, -inf  ;;  %v2174_v0 = vpop.permute.xlu2 %718 }
 0x114   : > { %v769_v1 = vrot.slane %v768_v57, 1  ;;  %v808_v4 = vmin.f32 %v800_v61, 0.0  ;;  %v819_v9 = vmul.f32 1.442695, %v809_v3  ;;  %v772_v23 = vrot.slane %v771_v20, 4 }
 0x115   : > { %v797_v12 = vrot.slane %v796_v5, 1  ;;  %v827_v15 = vmul.f32 1.442695, %v813_v7  ;;  %v658_v43 = vadd.f32 %v646_v33, %v2090_v30 }
 0x116   : > { %v770_v8 = vmax.f32 %v768_v57, %v769_v1  ;;  %v817_v11 = vmul.f32 1.442695, %v808_v4  ;;  %1530 = vpow2.f32 %v819_v9  ;;  %v773_v36 = vmax.f32 %v771_v20, %v772_v23 }
 0x117   : > { %v798_v18 = vmax.f32 %v796_v5, %v797_v12  ;;  %v1529_v21 = vpop.eup %1528  ;;  %v666_v48 = vmax.f32 %v658_v43, 0.0 }
 0x118   : > { %v802_v17 = vsub.f32 %v2132_v14, %v770_v8  ;;  %1532 = vpow2.f32 %v817_v11  ;;  %v831_v25 = vmul.f32 %v1529_v21, %v2081_v28  ;;  %v774_v45 = vrot.slane %v773_v36, 2 }
 0x119   : > { %1534 = vpow2.f32 %v827_v15  ;;  %v806_v26 = vsub.f32 %v2134_v16, %v798_v18  ;;  %v2169_v58 = vadd.f32 1e-07, %v666_v48 }
 0x11a   : > { %v810_v22 = vmin.f32 %v802_v17, 0.0  ;;  %v839_v39 = vsel %vm742_vm4, %v831_v25, 0.0  ;;  %v775_v51 = vmax.f32 %v773_v36, %v774_v45  ;;  %v895_v2 = vmul.f32 %v831_v25, %v2098_v38 }
 0x11b   : > { %v814_v41 = vmin.f32 %v806_v26, 0.0  ;;  %v840_v28 = vrot.slane %v839_v39, 4  ;;  %v739_v4 = vmul.f32 %v2174_v0, %v2169_v58 }
 0x11c   : > { %v1531_v27 = vpop.eup %1530  ;;  %v821_v32 = vmul.f32 1.442695, %v810_v22  ;;  %v776_v62 = vrot.slane %v775_v51, 1  ;;  %v903_v13 = vsel %vm742_vm4, %v895_v2, 0.0 }
 0x11d   : > { %v833_v40 = vmul.f32 %v1531_v27, %v2094_v34  ;;  %v829_v47 = vmul.f32 1.442695, %v814_v41  ;;  %v841_v49 = vadd.f32 %v840_v28, %v839_v39  ;;  %v778_v22 = vsel %vm742_vm4, %v739_v4, -inf }
 0x11e   : > { %v1533_v31 = vpop.eup %1532  ;;  %1536 = vpow2.f32 %v821_v32  ;;  %v777_v9 = vmax.f32 %v775_v51, %v776_v62 }
 0x11f   : > { %v1535_v37 = vpop.eup %1534  ;;  %v832_v42 = vmul.f32 %v1533_v31, %v2096_v35  ;;  %v853_v46 = vsel %vm742_vm4, %v833_v40, 0.0  ;;  %1538 = vpow2.f32 %v829_v47  ;;  %v842_v60 = vrot.slane %v841_v49, 2 }
 0x120   : > { %v837_v44 = vmul.f32 %v1535_v37, %v2113_v55  ;;  %v854_v50 = vrot.slane %v853_v46, 4  ;;  %v803_v21 = vsub.f32 %v2150_v6, %v777_v9  ;;  %v779_v31 = vrot.slane %v778_v22, 4  ;;  %v1112_v9 = vld [vmem:[%s2025_s12] sm:$0xff] }
 0x121   : > { %v846_v29 = vsel %vm742_vm4, %v832_v42, 0.0  ;;  %v843_v5 = vadd.f32 %v842_v60, %v841_v49  ;;  %v896_v38 = vmul.f32 %v832_v42, %v2119_v59 }
 0x122   : > { %v881_v34 = vsel %vm742_vm4, %v837_v44, 0.0  ;;  %v847_v35 = vrot.slane %v846_v29, 4  ;;  %v855_v55 = vadd.f32 %v854_v50, %v853_v46  ;;  %v811_v25 = vmin.f32 %v803_v21, 0.0 }
 0x123   : > { %v882_v57 = vrot.slane %v881_v34, 4  ;;  %v844_v18 = vrot.slane %v843_v5, 1  ;;  %v910_v26 = vsel %vm742_vm4, %v896_v38, 0.0  ;;  %v780_v42 = vmax.f32 %v778_v22, %v779_v31  ;;  %v1113_v38 = vld [vmem:[%s2025_s12 + $0x8] sm:$0xff] }
 0x124   : > { %v1537_v53 = vpop.eup %1536  ;;  %v848_v63 = vadd.f32 %v847_v35, %v846_v29  ;;  %v856_v7 = vrot.slane %v855_v55, 2  ;;  %v823_v37 = vmul.f32 1.442695, %v811_v25  ;;  %v911_v28 = vrot.slane %v910_v26, 4 }
 0x125   : > { %v2172_v61 = vmul.f32 %v1537_v53, %v2111_v54  ;;  %v1539_v1 = vpop.eup %1538  ;;  %v883_v3 = vadd.f32 %v882_v57, %v881_v34  ;;  %v897_v54 = vmul.f32 %v833_v40, %v2109_v52  ;;  %v904_v52 = vrot.slane %v903_v13, 4 }
 0x126   : > { %v849_v11 = vrot.slane %v848_v63, 2  ;;  %v2183_v12 = vmul.f32 %v1539_v1, %v2138_v19  ;;  %v857_v20 = vadd.f32 %v856_v7, %v855_v55  ;;  %v845_v32 = vadd.f32 %v844_v18, %v843_v5  ;;  %v1114_v7 = vld [vmem:[%s2025_s12 + $0x10] sm:$0xff] }
 0x127   : > { %v860_v8 = vsel %vm742_vm4, %v2172_v61, 0.0  ;;  %v884_v15 = vrot.slane %v883_v3, 2  ;;  %v917_v23 = vsel %vm742_vm4, %v897_v54, 0.0  ;;  %v901_v40 = vmul.f32 %v837_v44, %v2115_v56 }
 0x128   : > { %v861_v17 = vrot.slane %v860_v8, 4  ;;  %v850_v24 = vadd.f32 %v849_v11, %v848_v63  ;;  %v888_v19 = vsel %vm742_vm4, %v2183_v12, 0.0  ;;  %v858_v33 = vrot.slane %v857_v20, 1 }
 0x129   : > { %v885_v27 = vadd.f32 %v884_v15, %v883_v3  ;;  %v918_v36 = vrot.slane %v917_v23, 4  ;;  %v889_v41 = vrot.slane %v888_v19, 4  ;;  %v905_v43 = vadd.f32 %v904_v52, %v903_v13 }
 0x12a   : > { %v862_v59 = vadd.f32 %v861_v17, %v860_v8  ;;  %v851_v39 = vrot.slane %v850_v24, 1  ;;  %1540 = vpow2.f32 %v823_v37  ;;  %v781_v47 = vrot.slane %v780_v42, 2  ;;  %v1115_v8 = vld [vmem:[%s2025_s12 + $0x18] sm:$0xff] }
 0x12b   : > { %v886_v45 = vrot.slane %v885_v27, 1  ;;  %v2194_v29 = vadd.f32 1e-16, %v845_v32  ;;  %v859_v48 = vadd.f32 %v858_v33, %v857_v20  ;;  %v919_v49 = vadd.f32 %v918_v36, %v917_v23 }
 0x12c   : > { %v863_v46 = vrot.slane %v862_v59, 2  ;;  %v852_v50 = vadd.f32 %v851_v39, %v850_v24  ;;  %v945_v34 = vsel %vm742_vm4, %v901_v40, 0.0  ;;  %v890_v51 = vadd.f32 %v889_v41, %v888_v19 }
 0x12d   : > { %v782_v53 = vmax.f32 %v780_v42, %v781_v47  ;;  %v906_v56 = vrot.slane %v905_v43, 2  ;;  %v912_v44 = vadd.f32 %v911_v28, %v910_v26  ;;  %v887_v35 = vadd.f32 %v886_v45, %v885_v27 }
 0x12e   : > { %v864_v57 = vadd.f32 %v863_v46, %v862_v59  ;;  %1542 = vrcp.f32 %v2194_v29  ;;  %v920_v62 = vrot.slane %v919_v49, 2  ;;  %v2198_v63 = vadd.f32 1e-16, %v859_v48 }
 0x12f   : > { %v783_v60 = vrot.slane %v782_v53, 1  ;;  %v946_v1 = vrot.slane %v945_v34, 4  ;;  %v2200_v2 = vadd.f32 1e-16, %v852_v50  ;;  %v891_v3 = vrot.slane %v890_v51, 2 }
 0x130   : > { %v1541_v55 = vpop.eup %1540  ;;  %v907_v54 = vadd.f32 %v906_v56, %v905_v43  ;;  %v913_v11 = vrot.slane %v912_v44, 2  ;;  %v1117_v13 = vpack.c.bf16 %v1115_v8, %v1114_v7  ;;  %v2209_v15 = vadd.f32 1e-16, %v887_v35 }
 0x131   : > { %v2203_v4 = vmul.f32 %v1541_v55, %v2152_v10  ;;  %v784_v5 = vmax.f32 %v782_v53, %v783_v60  ;;  %v865_v17 = vrot.slane %v864_v57, 1  ;;  %v921_v21 = vadd.f32 %v920_v62, %v919_v49 }
 0x132   : > { %1544 = vrcp.f32 %v2198_v63  ;;  %1131 = vmatpush.bf16.msra.mxu1 %v1117_v13  ;;  %v1116_v22 = vpack.c.bf16 %v1113_v38, %v1112_v9  ;;  %v947_v23 = vadd.f32 %v946_v1, %v945_v34  ;;  %v892_v24 = vadd.f32 %v891_v3, %v890_v51 }
 0x133   : > { %v867_v18 = vsel %vm742_vm4, %v2203_v4, 0.0  ;;  %v804_v20 = vsub.f32 %v2169_v58, %v784_v5  ;;  %1546 = vrcp.f32 %v2200_v2  ;;  %v908_v25 = vrot.slane %v907_v54, 1 }
 0x134   : > { %v868_v10 = vrot.slane %v867_v18, 4  ;;  %v2216_v19 = vpop.eup %1542  ;;  %v914_v27 = vadd.f32 %v913_v11, %v912_v44  ;;  %1548 = vrcp.f32 %v2209_v15  ;;  %v866_v59 = vadd.f32 %v865_v17, %v864_v57 }
 0x135   : > { %v812_v52 = vmin.f32 %v804_v20, 0.0  ;;  %v978_v32 = vand.u32 2147483648, %v2194_v29  ;;  %v922_v33 = vrot.slane %v921_v21, 1  ;;  %v898_v36 = vmul.f32 %v2172_v61, %v2132_v14 }
 0x136   : > { %v869_v26 = vadd.f32 %v868_v10, %v867_v18  ;;  %1132 = vmatpush.bf16.msra.mxu1 %v1116_v22  ;;  %v968_v39 = vmul.f32 %v2216_v19, %v2194_v29  ;;  %v948_v40 = vrot.slane %v947_v23, 2  ;;  %v893_v41 = vrot.slane %v892_v24, 1 }
 0x137   : > { %v825_v31 = vmul.f32 1.442695, %v812_v52  ;;  %v2228_v45 = vadd.f32 %v908_v25, %v907_v54  ;;  %v976_v46 = vand.u32 2147483647, %v2194_v29  ;;  %v915_v47 = vrot.slane %v914_v27, 1 }
 0x138   : > { %v870_v37 = vrot.slane %v869_v26, 2  ;;  %v2224_v42 = vpop.eup %1544  ;;  %v2231_v48 = vadd.f32 1e-16, %v866_v59  ;;  %v2233_v14 = vor.u32 1.1754944e-38, %v978_v32  ;;  %v2235_v61 = vadd.f32 %v922_v33, %v921_v21 }
 0x139   : > { %1550 = vpow2.f32 %v825_v31  ;;  %v2226_v28 = vpop.eup %1546  ;;  %v924_v49 = vsel %vm742_vm4, %v898_v36, 0.0  ;;  %v969_v51 = vsub.f32 1.0, %v968_v39  ;;  %v998_v53 = vmul.f32 %v2224_v42, %v2198_v63 }
 0x13a   : > { %v871_v43 = vadd.f32 %v870_v37, %v869_v26  ;;  %v2238_v34 = vpop.eup %1548  ;;  %v949_v56 = vadd.f32 %v948_v40, %v947_v23  ;;  %v894_v44 = vadd.f32 %v893_v41, %v892_v24  ;;  %vm973_vm5 = vweird.f32 %v2216_v19 }
 0x13b   : > { %v1006_v35 = vand.u32 2147483647, %v2198_v63  ;;  %v983_v57 = vmul.f32 %v2226_v28, %v2200_v2  ;;  %v1008_v62 = vand.u32 2147483648, %v2198_v63  ;;  %v2247_v1 = vadd.f32 %v915_v47, %v914_v27 }
 0x13c   : > { %v872_v50 = vrot.slane %v871_v43, 1  ;;  %v925_v3 = vrot.slane %v924_v49, 4  ;;  %1552 = vrcp.f32 %v2231_v48  ;;  %vm972_vm6 = vweird.f32 %v2194_v29 }
 0x13d   : > { %v1058_v5 = vmul.f32 %v2238_v34, %v2209_v15  ;;  %v902_v7 = vmul.f32 %v2183_v12, %v2134_v16  ;;  %v970_v54 = vmul.f32 %v2216_v19, %v969_v51  ;;  %v999_v11 = vsub.f32 1.0, %v998_v53  ;;  %vm2304_vm13 = vmor %vm972_vm6, %vm973_vm5 }
 0x13e   : > { %v873_v60 = vadd.f32 %v872_v50, %v871_v43  ;;  %v950_v13 = vrot.slane %v949_v56, 1  ;;  %v2259_v38 = vadd.f32 1e-16, %v894_v44  ;;  %v984_v17 = vsub.f32 1.0, %v983_v57 }
 0x13f   : > { %v1551_v55 = vpop.eup %1550  ;;  %v899_v18 = vmul.f32 %v2203_v4, %v2150_v6  ;;  %vm1002_vm7 = vweird.f32 %v2198_v63  ;;  %v2266_v16 = vor.u32 1.1754944e-38, %v1008_v62  ;;  %v926_v12 = vadd.f32 %v925_v3, %v924_v49 }
 0x140   : > { %v2255_v8 = vadd.f32 1e-16, %v873_v60  ;;  %v836_v9 = vmul.f32 %v1551_v55, %v2174_v0  ;;  %v991_v0 = vand.u32 2147483647, %v2200_v2  ;;  %vm987_vm8 = vweird.f32 %v2200_v2 }
 0x141   : > { %v993_v10 = vand.u32 2147483648, %v2200_v2  ;;  %v1059_v22 = vsub.f32 1.0, %v1058_v5  ;;  %v952_v23 = vsel %vm742_vm4, %v902_v7, 0.0  ;;  %vm2275_vm9 = vcmp.eq.f32.partialorder %v976_v46, 8.507059e+37 }
 0x142   : > { %1554 = vrcp.f32 %v2255_v8  ;;  %v874_v20 = vsel %vm742_vm4, %v836_v9, 0.0  ;;  %v900_v6 = vmul.f32 %v836_v9, %v2169_v58  ;;  %v2273_v4 = vpop.eup %1552  ;;  %v1000_v52 = vmul.f32 %v2224_v42, %v999_v11 }
 0x143   : > { %v875_v21 = vrot.slane %v874_v20, 4  ;;  %v2280_v25 = vadd.f32 %v950_v13, %v949_v56  ;;  %1556 = vrcp.f32 %v2259_v38  ;;  %v971_v27 = vadd.f32 %v2216_v19, %v970_v54 }
 0x144   : > { %v985_v59 = vmul.f32 %v2226_v28, %v984_v17  ;;  %vm1062_vm10 = vweird.f32 %v2209_v15  ;;  %v1066_v58 = vand.u32 2147483647, %v2209_v15  ;;  %v931_v31 = vsel %vm742_vm4, %v899_v18, 0.0 }
 0x145   : > { %v876_v26 = vadd.f32 %v875_v21, %v874_v20  ;;  %vm2288_vm11 = vcmp.eq.f32.partialorder %v1006_v35, 8.507059e+37  ;;  %v1068_v33 = vand.u32 2147483648, %v2209_v15  ;;  %v927_v36 = vrot.slane %v926_v12, 2 }
 0x146   : > { %v953_v37 = vrot.slane %v952_v23, 4  ;;  %vm1003_vm12 = vweird.f32 %v2224_v42  ;;  %v1060_v41 = vmul.f32 %v2238_v34, %v1059_v22  ;;  %v1013_v43 = vmul.f32 %v2273_v4, %v2231_v48 }
 0x147   : > { %v877_v39 = vrot.slane %v876_v26, 2  ;;  %v938_v46 = vsel %vm742_vm4, %v900_v6, 0.0  ;;  %v1001_v49 = vadd.f32 %v2224_v42, %v1000_v52  ;;  %v932_v50 = vrot.slane %v931_v31, 4  ;;  %vm2326_vm0 = vmor %vm1002_vm7, %vm1003_vm12 }
 0x148   : > { %v2293_v40 = vpop.eup %1554  ;;  %v975_v56 = vsel %vm2304_vm13, %v2216_v19, %v971_v27  ;;  %v986_v44 = vadd.f32 %v2226_v28, %v985_v59  ;;  %vm988_vm14 = vweird.f32 %v2226_v28  ;;  %vm2316_vm15 = vcmp.eq.f32.partialorder %v991_v0, 8.507059e+37 }
 0x149   : > { %v878_v51 = vadd.f32 %v877_v39, %v876_v26  ;;  %v1028_v53 = vmul.f32 %v2293_v40, %v2255_v8  ;;  %v2320_v35 = vpop.eup %1556  ;;  %v928_v57 = vadd.f32 %v927_v36, %v926_v12  ;;  %v954_v60 = vadd.f32 %v953_v37, %v952_v23  ;;  %vm2337_vm2 = vmor %vm987_vm8, %vm988_vm14 }
 0x14a   : > { %v939_v62 = vrot.slane %v938_v46, 4  ;;  %v994_v3 = vor.u32 1.1754944e-38, %v993_v10  ;;  %v1061_v5 = vadd.f32 %v2238_v34, %v1060_v41  ;;  %vm1063_vm1 = vweird.f32 %v2238_v34 }
 0x14b   : > { %v879_v55 = vrot.slane %v878_v51, 1  ;;  %v1014_v7 = vsub.f32 1.0, %v1013_v43  ;;  %v1005_v9 = vsel %vm2326_vm0, %v2224_v42, %v1001_v49  ;;  %v933_v63 = vadd.f32 %v932_v50, %v931_v31  ;;  %vm2355_vm5 = vmor %vm1062_vm10, %vm1063_vm1 }
 0x14c   : > { %v1029_v13 = vsub.f32 1.0, %v1028_v53  ;;  %v980_v17 = vsel %vm2275_vm9, %v2233_v14, %v975_v56  ;;  %v990_v18 = vsel %vm2337_vm2, %v2226_v28, %v986_v44  ;;  %vm2347_vm3 = vcmp.eq.f32.partialorder %v1066_v58, 8.507059e+37 }
 0x14d   : > { %v880_v11 = vadd.f32 %v879_v55, %v878_v51  ;;  %v1073_v2 = vmul.f32 %v2320_v35, %v2259_v38  ;;  %v929_v0 = vrot.slane %v928_v57, 1  ;;  %v955_v12 = vrot.slane %v954_v60, 2 }
 0x14e   : > { %v940_v14 = vadd.f32 %v939_v62, %v938_v46  ;;  %v1010_v28 = vsel %vm2288_vm11, %v2266_v16, %v1005_v9  ;;  %v1065_v10 = vsel %vm2355_vm5, %v2238_v34, %v1061_v5  ;;  %v1069_v22 = vor.u32 1.1754944e-38, %v1068_v33 }
 0x14f   : > { %v2359_v21 = vadd.f32 1e-16, %v880_v11  ;;  %v1015_v15 = vmul.f32 %v2273_v4, %v1014_v7  ;;  %v995_v23 = vsel %vm2316_vm15, %v994_v3, %v990_v18  ;;  %v934_v6 = vrot.slane %v933_v63, 2 }
 0x150   : > { %v1030_v24 = vmul.f32 %v2293_v40, %v1029_v13  ;;  %v981_v52 = vmul.f32 %v980_v17, %v2228_v45  ;;  %v1021_v26 = vand.u32 2147483647, %v2231_v48  ;;  %v1023_v16 = vand.u32 2147483648, %v2231_v48 }
 0x151   : > { %1558 = vrcp.f32 %v2359_v21  ;;  %v1074_v27 = vsub.f32 1.0, %v1073_v2  ;;  %v2376_v34 = vmul.f32 %v1010_v28, %v2235_v61  ;;  %v930_v59 = vadd.f32 %v929_v0, %v928_v57 }
 0x152   : > { %v2378_v58 = vadd.f32 %v955_v12, %v954_v60  ;;  %v941_v31 = vrot.slane %v940_v14, 2  ;;  %v996_v32 = vmul.f32 %v995_v23, %v2247_v1  ;;  %v2383_v33 = vsel %vm2347_vm3, %v1069_v22, %v1065_v10 }
 0x153   : > { %v1016_v45 = vadd.f32 %v2273_v4, %v1015_v15  ;;  %vm1018_vm6 = vweird.f32 %v2273_v4  ;;  %vm1017_vm7 = vweird.f32 %v2231_v48  ;;  %v935_v36 = vadd.f32 %v934_v6, %v933_v63 }
 0x154   : > { %v1031_v61 = vadd.f32 %v2293_v40, %v1030_v24  ;;  %vm1033_vm8 = vweird.f32 %v2293_v40  ;;  %vm2390_vm9 = vcmp.eq.f32.partialorder %v1021_v26, 8.507059e+37  ;;  %v1024_v1 = vor.u32 1.1754944e-38, %v1023_v16  ;;  %vm2396_vm10 = vmor %vm1017_vm7, %vm1018_vm6  ;;  %v1525_v16 = vld [vmem:[%s558_s18] ss:$0 sm:$0xff]  ;;  %s2602_s18 = sld [smem:[#allocation19_spill]] }
 0x155   : > { %v1038_v39 = vand.u32 2147483648, %v2255_v8  ;;  %v1075_v41 = vmul.f32 %v2320_v35, %v1074_v27  ;;  %v957_v48 = vrot.slane %v2378_v58, 1  ;;  %v942_v47 = vadd.f32 %v941_v31, %v940_v14 }
 0x156   : > { %vm1032_vm11 = vweird.f32 %v2255_v8  ;;  %v1036_v49 = vand.u32 2147483647, %v2255_v8  ;;  %v1020_v50 = vsel %vm2396_vm10, %v2273_v4, %v1016_v45  ;;  %vm1077_vm13 = vweird.f32 %v2259_v38 }
 0x157   : > { %v1559_v43 = vpop.eup %1558  ;;  %vm2406_vm12 = vmor %vm1032_vm11, %vm1033_vm8  ;;  %v1081_v56 = vand.u32 2147483647, %v2259_v38  ;;  %v936_v44 = vrot.slane %v935_v36, 1  ;;  %v1083_v8 = vand.u32 2147483648, %v2259_v38  ;;  %vm1095_vm14 = vcmask 1041409  }
 0x158   : > { %v1043_v53 = vmul.f32 %v1559_v43, %v2359_v21  ;;  %v1035_v29 = vsel %vm2406_vm12, %v2293_v40, %v1031_v61  ;;  %v1039_v57 = vor.u32 1.1754944e-38, %v1038_v39  ;;  %v1076_v60 = vadd.f32 %v2320_v35, %v1075_v41 }
 0x159   : > { %vm1078_vm15 = vweird.f32 %v2320_v35  ;;  %v1025_v55 = vsel %vm2390_vm9, %v1024_v1, %v1020_v50  ;;  %v943_v62 = vrot.slane %v942_v47, 1  ;;  %vm1037_vm0 = vcmp.eq.f32.partialorder %v1036_v49, 8.507059e+37 }
 0x15a   : > { %v1044_v4 = vsub.f32 1.0, %v1043_v53  ;;  %v1053_v19 = vand.u32 2147483648, %v2359_v21  ;;  %v1040_v3 = vsel %vm1037_vm0, %v1039_v57, %v1035_v29  ;;  %vm1048_vm1 = vweird.f32 %v1559_v43  ;;  %vm2425_vm2 = vmor %vm1077_vm13, %vm1078_vm15  ;;  %p1399_p10 = scmp.ne.s32.totalorder %s2602_s18, 1 }
 0x15b   : > { %v1051_v40 = vand.u32 2147483647, %v2359_v21  ;;  %v937_v7 = vadd.f32 %v936_v44, %v935_v36  ;;  %vm2429_vm3 = vcmp.eq.f32.partialorder %v1081_v56, 8.507059e+37  ;;  %v1096_v63 = vsel %vm1095_vm14, %v996_v32, %v981_v52 }
 0x15c   : > { %v1045_v5 = vmul.f32 %v1559_v43, %v1044_v4  ;;  %vm1097_vm5 = vcmask 1042434   ;;  %v1026_v11 = vmul.f32 %v1025_v55, %v930_v59  ;;  %vm1047_vm6 = vweird.f32 %v2359_v21 }
 0x15d   : > { %v1080_v17 = vsel %vm2425_vm2, %v2320_v35, %v1076_v60  ;;  %v1041_v38 = vmul.f32 %v1040_v3, %v937_v7  ;;  %vm1049_vm7 = vmor %vm1047_vm6, %vm1048_vm1  ;;  %v1054_v18 = vor.u32 1.1754944e-38, %v1053_v19  ;;  %v1084_v20 = vor.u32 1.1754944e-38, %v1083_v8 }
 0x15e   : > { %v1046_v13 = vadd.f32 %v1559_v43, %v1045_v5  ;;  %vm1099_vm8 = vcmask 1043459   ;;  %v944_v2 = vadd.f32 %v943_v62, %v942_v47  ;;  %vm1052_vm9 = vcmp.eq.f32.partialorder %v1051_v40, 8.507059e+37 }
 0x15f   : > { %vm1101_vm10 = vcmask 1044484   ;;  %v1085_v12 = vsel %vm2429_vm3, %v1084_v20, %v1080_v17  ;;  %v1098_v14 = vsel %vm1097_vm5, %v2376_v34, %v1096_v63  ;;  %vm1103_vm11 = vcmask 1045509  }
 0x160   : > { %v1050_v42 = vsel %vm1049_vm7, %v1559_v43, %v1046_v13  ;;  %v958_v35 = vadd.f32 %v957_v48, %v2378_v58  ;;  %v1100_v28 = vsel %vm1099_vm8, %v1026_v11, %v1098_v14  ;;  %vm1105_vm12 = vcmask 1046534   ;;  %v1527_v58 = vld [vmem:[%s564_s27] ss:$0 sm:$0xff] }
 0x161   : > { %v1055_v0 = vsel %vm1052_vm9, %v1054_v18, %v1050_v42  ;;  %v1071_v10 = vmul.f32 %v2383_v33, %v2280_v25  ;;  %v1102_v22 = vsel %vm1101_vm10, %v1041_v38, %v1100_v28  ;;  %vm1107_vm13 = vcmask 1047559   ;;  %v1526_v25 = vld [vmem:[%s561_s13] ss:$0 sm:$0xff] }
 0x162   : > { %v1056_v21 = vmul.f32 %v1055_v0, %v944_v2  ;;  %v1086_v15 = vmul.f32 %v1085_v12, %v958_v35 }
 0x164   : > { %v1104_v23 = vsel %vm1103_vm11, %v1056_v21, %v1102_v22 }
 0x165   : > { %v1106_v6 = vsel %vm1105_vm12, %v1071_v10, %v1104_v23 }
 0x166   : > { %v1108_v24 = vsel %vm1107_vm13, %v1086_v15, %v1106_v6 }
 0x167   : > { %v1110_v52 = vadd.f32 %v1108_v24, %v2090_v30 }
 0x169   : > { %v1111_v26 = vpack.c.bf16 %v1110_v52, %v1110_v52 }
 0x16b   : > { %1398 = vmatmul.msk.bf16.vlgmr.msra.gmra.mxu1 %vm742_vm4, %v1111_v26 }
 0x1e8   : > { %v1134_v27 = vpop.f32.mrf.mxu1 }
 0x1e9   : > { %v1135_v34 = vadd.f32 %v1525_v16, %v1134_v27 }
 0x1eb   : > { %v1138_v59 = vadd.f32 %v1135_v34, %v2090_v30 }
 0x1ed   : > { %v1143_v31 = vmul.f32 %v1526_v25, %v1138_v59 }
 0x1ef   : > { %v1148_v32 = vadd.f32 %v1527_v58, %v1143_v31  ;;  %1154 = sbr.rel (%p1399_p10) target bundleno = 516 (0x204), region = 84 }
 0x1f0   : > { %v1136_v33 = vpop.f32.mrf.mxu1 }
 0x1f1   : > { %v1149_v45 = vmax.f32 %v1148_v32, 0.0 }
 0x1f3   : > { %1151 = vst.msk [vmem:[#allocation3] sm:$0xff] %vm742_vm4, %v1149_v45 }
 0x1f4   : > { %v1156_v36 = vsel %vm742_vm4, %v1149_v45, 0.0  ;;  %v1155_v41 = vld [vmem:[#allocation4] sm:$0x1]  ;;  %vm1164_vm14 = vcmask 253952  }
 0x1f5   : > { %v1157_v61 = vrot.slane %v1156_v36, 4 }
 0x1f7   : > { %v1158_v37 = vadd.f32 %v1157_v61, %v1156_v36 }
 0x1f9   : > { %v1159_v1 = vrot.slane %v1158_v37, 2 }
 0x1fb   : > { %v1160_v30 = vadd.f32 %v1159_v1, %v1158_v37 }
 0x1fd   : > { %v1161_v39 = vrot.slane %v1160_v30, 1 }
 0x1ff   : > { %v1162_v43 = vadd.f32 %v1161_v39, %v1160_v30 }
 0x201   : > { %v1163_v46 = vadd.f32 %v1162_v43, %v1155_v41 }
 0x203   : > { %1165 = vst.msk [vmem:[#allocation4] sm:$0x1] %vm1164_vm14, %v1163_v46 }
 0x204 PF: > { %vm1175_vm15 = vcmask (%p578_p9), 253952  }
 0x207   : > { %1172 = sbr.rel (!%p578_p9) target bundleno = 526 (0x20e), region = 92 }
 0x20a   : > { %v1169_v48 = vld [vmem:[#allocation3] sm:$0xff]  ;;  %v1173_v47 = vld [vmem:[#allocation4] sm:$0x1] (%p578_p9) }
 0x20b   : > { %1170 = vst.msk [vmem:[#allocation2] sm:$0xff] %vm742_vm4, %v1169_v48  ;;  %v1174_v49 = vmul.f32 (%p578_p9), 0.125, %v1173_v47 }
 0x20d   : > { %1176 = vst.msk [vmem:[%s567_s0] sm:$0x1] %vm1175_vm15, %v1174_v49 }
 0x20e PF: > { %s28_s19 = sadd.s32 1, %s1782_s19   ;;  %s2605_s9 = sld [smem:[#allocation16_spill]] }
 0x20f   : > { %p25_p11 = scmp.ge.s32.totalorder %s28_s19, 6   ;;  %s2606_s11 = sld [smem:[#allocation24_spill]] }
 0x210   : > { %s2607_s12 = sld [smem:[#allocation17_spill]]  ;;  %s2614_s30 = smov %s1746_s10 }
 0x211   : > { %s2608_s13 = sld [smem:[#allocation18_spill]] }
 0x212   : > { %s2609_s14 = sld [smem:[#allocation25_spill]]  ;;  %27 = sbr.rel (!%p25_p11) target bundleno = 22 (0x16), region = 170 }
 0x213   : > { %s2610_s15 = sld [smem:[#allocation20_spill]] }
 0x214   : > { %s2611_s16 = sld [smem:[#allocation21_spill]]  ;;  %s2615_s10 = smov %s2605_s9 }
 0x215   : > { %s2612_s17 = sld [smem:[#allocation22_spill]] }
 0x216   : > { %s2613_s18 = sld [smem:[#allocation23_spill]] }
 0x217   :  { %1194 = vsyncpa [#allocation6], 1 }
 0x218   :  { %1196 = vsyncpa [#allocation6 + $0x1], 1 }
 0x219   :  { %1197 = vsyncpa [#allocation8], 1 }
 0x21a   :  { %1199 = vsyncpa [#allocation8 + $0x1], 1 }
 0x21b   :  { %1200 = vsyncpa [#allocation11], 1 }
 0x21c   :  { %1202 = vsyncpa [#allocation11 + $0x1], 1 }

</bundles_post_ra>
